<compile_context>
chip_gen: v7x
topology: tpu7x:2x2x1
jax: 0.10.0
libtpu: 0.0.40
codegen_flags: <defaults>
</compile_context>

<pallas_src>
import jax
import jax.numpy as jnp
from jax import lax
from jax.experimental import pallas as pl
from jax.experimental.pallas import tpu as pltpu

_LANE = 128
_CHUNK_ROWS = 16          # 16 sublane rows * 128 lanes = 2048 pixels per inner step
_QUANT = _CHUNK_ROWS * _LANE


def sandwich_kernel(x_ref, rays_ref, w1_ref, w2_ref, out_ref):
    # x_ref:    (9, R, 128)  per-channel pixel slabs: [albedo(3) | spec(3) | time(3)]
    # rays_ref: (6, R, 128)
    # w1_ref:   SMEM (72,)   mlp1 weight, row-major (out=6, in=12), in-order [spec,time,rays]
    # w2_ref:   SMEM (18,)   mlp2 weight, row-major (out=3, in=6)
    # out_ref:  (3, R, 128)
    n_rows = x_ref.shape[1]
    n_chunks = n_rows // _CHUNK_ROWS

    # Hoist the 90 scalar weight reads out of the pixel loop (scalar slots have slack).
    w1 = [w1_ref[i] for i in range(72)]
    w2 = [w2_ref[i] for i in range(18)]

    def body(step, carry):
        r0 = pl.multiple_of(step * _CHUNK_ROWS, _CHUNK_ROWS)
        rows = pl.ds(r0, _CHUNK_ROWS)

        # 12 input channels of mlp1 in concat order [spec(3), time(3), rays(6)];
        # the torch.cat is folded away — channels are just indexed directly.
        inp = [x_ref[3 + c, rows, :] for c in range(6)] + \
              [rays_ref[c, rows, :] for c in range(6)]

        # mlp1 (12 -> 6) + ReLU: pure VPU FMAs, never touches the MXU.
        hs = []
        for o in range(6):
            acc = inp[0] * w1[o * 12]
            for c in range(1, 12):
                acc = acc + inp[c] * w1[o * 12 + c]
            hs.append(jnp.maximum(acc, 0.0))

        # mlp2 (6 -> 3) + albedo residual add (no output activation).
        for o in range(3):
            acc = hs[0] * w2[o * 6]
            for c in range(1, 6):
                acc = acc + hs[c] * w2[o * 6 + c]
            out_ref[o, rows, :] = (x_ref[o, rows, :] + acc).astype(out_ref.dtype)

        return carry

    lax.fori_loop(0, n_chunks, body, 0, unroll=False)


def _tiling(hw, desired):
    """Pad pixel count to the 2048-px quantum and pick a lane tile <= desired."""
    desired = max(_QUANT, (desired // _QUANT) * _QUANT)
    hw_pad = -(-hw // _QUANT) * _QUANT          # round up to quantum
    tn = min(desired, hw_pad)                   # tile (multiple of _QUANT)
    hw_pad = -(-hw_pad // tn) * tn              # make divisible by the tile
    return hw_pad, tn


def sandwich_forward(x, rays, w1, w2, *, tile_n=32768):
    """x: (B, 9, H, W) f32, rays: (B, 6, H, W) f32 -> (B, 3, H, W) f32."""
    B, C, H, W = x.shape
    assert C == 9 and rays.shape == (B, 6, H, W)
    assert w1.shape == (6, 12) and w2.shape == (3, 6)
    HW = H * W

    hw_pad, tn = _tiling(HW, tile_n)
    n_tiles = hw_pad // tn                      # grid is (B, n_tiles): B*n_tiles >= 2
    r_tile = tn // _LANE                        # sublane rows per tile (multiple of 16)
    r_total = hw_pad // _LANE

    # Free reshapes to per-channel dense pixel slabs; pad only when HW needs it.
    x3 = x.reshape(B, 9, HW)
    r3 = rays.reshape(B, 6, HW)
    if hw_pad != HW:
        pad = hw_pad - HW
        x3 = jnp.pad(x3, ((0, 0), (0, 0), (0, pad)))
        r3 = jnp.pad(r3, ((0, 0), (0, 0), (0, pad)))
    x4 = x3.reshape(B, 9, r_total, _LANE)
    r4 = r3.reshape(B, 6, r_total, _LANE)

    w1f = w1.reshape(-1).astype(jnp.float32)    # (72,)  -> SMEM
    w2f = w2.reshape(-1).astype(jnp.float32)    # (18,)  -> SMEM

    cost = pl.CostEstimate(
        flops=2 * B * hw_pad * (6 * 12 + 3 * 6),
        bytes_accessed=(9 + 6 + 3) * B * hw_pad * 4,
        transcendentals=0,
    )

    out = pl.pallas_call(
        sandwich_kernel,
        out_shape=jax.ShapeDtypeStruct((B, 3, r_total, _LANE), jnp.float32),
        grid_spec=pltpu.PrefetchScalarGridSpec(
            num_scalar_prefetch=0,
            grid=(B, n_tiles),
            in_specs=[
                pl.BlockSpec((pl.Squeezed(), 9, r_tile, _LANE),
                             lambda b, i: (b, 0, i, 0)),
                pl.BlockSpec((pl.Squeezed(), 6, r_tile, _LANE),
                             lambda b, i: (b, 0, i, 0)),
                pl.BlockSpec(memory_space=pltpu.MemorySpace.SMEM),
                pl.BlockSpec(memory_space=pltpu.MemorySpace.SMEM),
            ],
            out_specs=pl.BlockSpec((pl.Squeezed(), 3, r_tile, _LANE),
                                   lambda b, i: (b, 0, i, 0)),
        ),
        compiler_params=pltpu.CompilerParams(
            dimension_semantics=("parallel", "parallel")),
        cost_estimate=cost,
    )(x4, r4, w1f, w2f)

    out = out.reshape(B, 3, hw_pad)[:, :, :HW].reshape(B, 3, H, W)
    return out


def sandwich_reference(x, rays, w1, w2):
    """Pure-JAX reference replicating the PyTorch forward (NCHW, 1x1 convs, no act)."""
    albedo, spec, tf = x[:, 0:3], x[:, 3:6], x[:, 6:9]
    specular = jnp.concatenate([spec, tf, rays], axis=1)       # (B, 12, H, W)
    h = jnp.einsum('oc,bchw->bohw', w1, specular)
    h = jnp.maximum(h, 0.0)
    s = jnp.einsum('oc,bchw->bohw', w2, h)
    return albedo + s


if __name__ == "__main__":
    key = jax.random.PRNGKey(0)
    kx, kr, kw1, kw2 = jax.random.split(key, 4)

    B, H, W = 2, 16, 16
    x = jax.random.normal(kx, (B, 9, H, W), dtype=jnp.float32)
    rays = jax.random.normal(kr, (B, 6, H, W), dtype=jnp.float32)

    # Deterministic parameter init (Conv2d k=1, bias=False): (out_ch, in_ch).
    w1 = jax.random.normal(kw1, (6, 12), dtype=jnp.float32) * 0.2
    w2 = jax.random.normal(kw2, (3, 6), dtype=jnp.float32) * 0.2

    out = jax.block_until_ready(sandwich_forward(x, rays, w1, w2))
    ref = sandwich_reference(x, rays, w1, w2)

    assert out.shape == (B, 3, H, W)
    assert jnp.max(jnp.abs(out - ref)) < 1e-4

    print("KERNEL_OK")
</pallas_src>

<mosaic_0001>
module attributes {stable_mosaic.version = 11 : i64} {
  func.func @sandwich_kernel(%arg0: i32, %arg1: i32, %arg2: memref<1x9x16x128xf32, #tpu.memory_space<vmem>>, %arg3: memref<1x6x16x128xf32, #tpu.memory_space<vmem>>, %arg4: memref<72xf32, #tpu.memory_space<smem>>, %arg5: memref<18xf32, #tpu.memory_space<smem>>, %arg6: memref<1x3x16x128xf32, #tpu.memory_space<vmem>>) attributes {dimension_semantics = [#tpu.dimension_semantics<parallel>, #tpu.dimension_semantics<parallel>], iteration_bounds = array<i64: 2, 1>, scalar_prefetch = 0 : i64, scratch_operands = 0 : i64, tpu.core_type = #tpu.core_type<tc>, window_params = [{transform_indices = @transform_0, window_bounds = array<i64: 1, 9, 16, 128>}, {transform_indices = @transform_1, window_bounds = array<i64: 1, 6, 16, 128>}, {transform_indices = @transform_2, window_bounds = array<i64: 72>}, {transform_indices = @transform_3, window_bounds = array<i64: 18>}, {transform_indices = @transform_4, window_bounds = array<i64: 1, 3, 16, 128>}]} {
    %c0 = arith.constant 0 : index
    %0 = memref.load %arg4[%c0] : memref<72xf32, #tpu.memory_space<smem>>
    %c1 = arith.constant 1 : index
    %1 = memref.load %arg4[%c1] : memref<72xf32, #tpu.memory_space<smem>>
    %c2 = arith.constant 2 : index
    %2 = memref.load %arg4[%c2] : memref<72xf32, #tpu.memory_space<smem>>
    %c3 = arith.constant 3 : index
    %3 = memref.load %arg4[%c3] : memref<72xf32, #tpu.memory_space<smem>>
    %c4 = arith.constant 4 : index
    %4 = memref.load %arg4[%c4] : memref<72xf32, #tpu.memory_space<smem>>
    %c5 = arith.constant 5 : index
    %5 = memref.load %arg4[%c5] : memref<72xf32, #tpu.memory_space<smem>>
    %c6 = arith.constant 6 : index
    %6 = memref.load %arg4[%c6] : memref<72xf32, #tpu.memory_space<smem>>
    %c7 = arith.constant 7 : index
    %7 = memref.load %arg4[%c7] : memref<72xf32, #tpu.memory_space<smem>>
    %c8 = arith.constant 8 : index
    %8 = memref.load %arg4[%c8] : memref<72xf32, #tpu.memory_space<smem>>
    %c9 = arith.constant 9 : index
    %9 = memref.load %arg4[%c9] : memref<72xf32, #tpu.memory_space<smem>>
    %c10 = arith.constant 10 : index
    %10 = memref.load %arg4[%c10] : memref<72xf32, #tpu.memory_space<smem>>
    %c11 = arith.constant 11 : index
    %11 = memref.load %arg4[%c11] : memref<72xf32, #tpu.memory_space<smem>>
    %c12 = arith.constant 12 : index
    %12 = memref.load %arg4[%c12] : memref<72xf32, #tpu.memory_space<smem>>
    %c13 = arith.constant 13 : index
    %13 = memref.load %arg4[%c13] : memref<72xf32, #tpu.memory_space<smem>>
    %c14 = arith.constant 14 : index
    %14 = memref.load %arg4[%c14] : memref<72xf32, #tpu.memory_space<smem>>
    %c15 = arith.constant 15 : index
    %15 = memref.load %arg4[%c15] : memref<72xf32, #tpu.memory_space<smem>>
    %c16 = arith.constant 16 : index
    %16 = memref.load %arg4[%c16] : memref<72xf32, #tpu.memory_space<smem>>
    %c17 = arith.constant 17 : index
    %17 = memref.load %arg4[%c17] : memref<72xf32, #tpu.memory_space<smem>>
    %c18 = arith.constant 18 : index
    %18 = memref.load %arg4[%c18] : memref<72xf32, #tpu.memory_space<smem>>
    %c19 = arith.constant 19 : index
    %19 = memref.load %arg4[%c19] : memref<72xf32, #tpu.memory_space<smem>>
    %c20 = arith.constant 20 : index
    %20 = memref.load %arg4[%c20] : memref<72xf32, #tpu.memory_space<smem>>
    %c21 = arith.constant 21 : index
    %21 = memref.load %arg4[%c21] : memref<72xf32, #tpu.memory_space<smem>>
    %c22 = arith.constant 22 : index
    %22 = memref.load %arg4[%c22] : memref<72xf32, #tpu.memory_space<smem>>
    %c23 = arith.constant 23 : index
    %23 = memref.load %arg4[%c23] : memref<72xf32, #tpu.memory_space<smem>>
    %c24 = arith.constant 24 : index
    %24 = memref.load %arg4[%c24] : memref<72xf32, #tpu.memory_space<smem>>
    %c25 = arith.constant 25 : index
    %25 = memref.load %arg4[%c25] : memref<72xf32, #tpu.memory_space<smem>>
    %c26 = arith.constant 26 : index
    %26 = memref.load %arg4[%c26] : memref<72xf32, #tpu.memory_space<smem>>
    %c27 = arith.constant 27 : index
    %27 = memref.load %arg4[%c27] : memref<72xf32, #tpu.memory_space<smem>>
    %c28 = arith.constant 28 : index
    %28 = memref.load %arg4[%c28] : memref<72xf32, #tpu.memory_space<smem>>
    %c29 = arith.constant 29 : index
    %29 = memref.load %arg4[%c29] : memref<72xf32, #tpu.memory_space<smem>>
    %c30 = arith.constant 30 : index
    %30 = memref.load %arg4[%c30] : memref<72xf32, #tpu.memory_space<smem>>
    %c31 = arith.constant 31 : index
    %31 = memref.load %arg4[%c31] : memref<72xf32, #tpu.memory_space<smem>>
    %c32 = arith.constant 32 : index
    %32 = memref.load %arg4[%c32] : memref<72xf32, #tpu.memory_space<smem>>
    %c33 = arith.constant 33 : index
    %33 = memref.load %arg4[%c33] : memref<72xf32, #tpu.memory_space<smem>>
    %c34 = arith.constant 34 : index
    %34 = memref.load %arg4[%c34] : memref<72xf32, #tpu.memory_space<smem>>
    %c35 = arith.constant 35 : index
    %35 = memref.load %arg4[%c35] : memref<72xf32, #tpu.memory_space<smem>>
    %c36 = arith.constant 36 : index
    %36 = memref.load %arg4[%c36] : memref<72xf32, #tpu.memory_space<smem>>
    %c37 = arith.constant 37 : index
    %37 = memref.load %arg4[%c37] : memref<72xf32, #tpu.memory_space<smem>>
    %c38 = arith.constant 38 : index
    %38 = memref.load %arg4[%c38] : memref<72xf32, #tpu.memory_space<smem>>
    %c39 = arith.constant 39 : index
    %39 = memref.load %arg4[%c39] : memref<72xf32, #tpu.memory_space<smem>>
    %c40 = arith.constant 40 : index
    %40 = memref.load %arg4[%c40] : memref<72xf32, #tpu.memory_space<smem>>
    %c41 = arith.constant 41 : index
    %41 = memref.load %arg4[%c41] : memref<72xf32, #tpu.memory_space<smem>>
    %c42 = arith.constant 42 : index
    %42 = memref.load %arg4[%c42] : memref<72xf32, #tpu.memory_space<smem>>
    %c43 = arith.constant 43 : index
    %43 = memref.load %arg4[%c43] : memref<72xf32, #tpu.memory_space<smem>>
    %c44 = arith.constant 44 : index
    %44 = memref.load %arg4[%c44] : memref<72xf32, #tpu.memory_space<smem>>
    %c45 = arith.constant 45 : index
    %45 = memref.load %arg4[%c45] : memref<72xf32, #tpu.memory_space<smem>>
    %c46 = arith.constant 46 : index
    %46 = memref.load %arg4[%c46] : memref<72xf32, #tpu.memory_space<smem>>
    %c47 = arith.constant 47 : index
    %47 = memref.load %arg4[%c47] : memref<72xf32, #tpu.memory_space<smem>>
    %c48 = arith.constant 48 : index
    %48 = memref.load %arg4[%c48] : memref<72xf32, #tpu.memory_space<smem>>
    %c49 = arith.constant 49 : index
    %49 = memref.load %arg4[%c49] : memref<72xf32, #tpu.memory_space<smem>>
    %c50 = arith.constant 50 : index
    %50 = memref.load %arg4[%c50] : memref<72xf32, #tpu.memory_space<smem>>
    %c51 = arith.constant 51 : index
    %51 = memref.load %arg4[%c51] : memref<72xf32, #tpu.memory_space<smem>>
    %c52 = arith.constant 52 : index
    %52 = memref.load %arg4[%c52] : memref<72xf32, #tpu.memory_space<smem>>
    %c53 = arith.constant 53 : index
    %53 = memref.load %arg4[%c53] : memref<72xf32, #tpu.memory_space<smem>>
    %c54 = arith.constant 54 : index
    %54 = memref.load %arg4[%c54] : memref<72xf32, #tpu.memory_space<smem>>
    %c55 = arith.constant 55 : index
    %55 = memref.load %arg4[%c55] : memref<72xf32, #tpu.memory_space<smem>>
    %c56 = arith.constant 56 : index
    %56 = memref.load %arg4[%c56] : memref<72xf32, #tpu.memory_space<smem>>
    %c57 = arith.constant 57 : index
    %57 = memref.load %arg4[%c57] : memref<72xf32, #tpu.memory_space<smem>>
    %c58 = arith.constant 58 : index
    %58 = memref.load %arg4[%c58] : memref<72xf32, #tpu.memory_space<smem>>
    %c59 = arith.constant 59 : index
    %59 = memref.load %arg4[%c59] : memref<72xf32, #tpu.memory_space<smem>>
    %c60 = arith.constant 60 : index
    %60 = memref.load %arg4[%c60] : memref<72xf32, #tpu.memory_space<smem>>
    %c61 = arith.constant 61 : index
    %61 = memref.load %arg4[%c61] : memref<72xf32, #tpu.memory_space<smem>>
    %c62 = arith.constant 62 : index
    %62 = memref.load %arg4[%c62] : memref<72xf32, #tpu.memory_space<smem>>
    %c63 = arith.constant 63 : index
    %63 = memref.load %arg4[%c63] : memref<72xf32, #tpu.memory_space<smem>>
    %c64 = arith.constant 64 : index
    %64 = memref.load %arg4[%c64] : memref<72xf32, #tpu.memory_space<smem>>
    %c65 = arith.constant 65 : index
    %65 = memref.load %arg4[%c65] : memref<72xf32, #tpu.memory_space<smem>>
    %c66 = arith.constant 66 : index
    %66 = memref.load %arg4[%c66] : memref<72xf32, #tpu.memory_space<smem>>
    %c67 = arith.constant 67 : index
    %67 = memref.load %arg4[%c67] : memref<72xf32, #tpu.memory_space<smem>>
    %c68 = arith.constant 68 : index
    %68 = memref.load %arg4[%c68] : memref<72xf32, #tpu.memory_space<smem>>
    %c69 = arith.constant 69 : index
    %69 = memref.load %arg4[%c69] : memref<72xf32, #tpu.memory_space<smem>>
    %c70 = arith.constant 70 : index
    %70 = memref.load %arg4[%c70] : memref<72xf32, #tpu.memory_space<smem>>
    %c71 = arith.constant 71 : index
    %71 = memref.load %arg4[%c71] : memref<72xf32, #tpu.memory_space<smem>>
    %c0_0 = arith.constant 0 : index
    %72 = memref.load %arg5[%c0_0] : memref<18xf32, #tpu.memory_space<smem>>
    %c1_1 = arith.constant 1 : index
    %73 = memref.load %arg5[%c1_1] : memref<18xf32, #tpu.memory_space<smem>>
    %c2_2 = arith.constant 2 : index
    %74 = memref.load %arg5[%c2_2] : memref<18xf32, #tpu.memory_space<smem>>
    %c3_3 = arith.constant 3 : index
    %75 = memref.load %arg5[%c3_3] : memref<18xf32, #tpu.memory_space<smem>>
    %c4_4 = arith.constant 4 : index
    %76 = memref.load %arg5[%c4_4] : memref<18xf32, #tpu.memory_space<smem>>
    %c5_5 = arith.constant 5 : index
    %77 = memref.load %arg5[%c5_5] : memref<18xf32, #tpu.memory_space<smem>>
    %c6_6 = arith.constant 6 : index
    %78 = memref.load %arg5[%c6_6] : memref<18xf32, #tpu.memory_space<smem>>
    %c7_7 = arith.constant 7 : index
    %79 = memref.load %arg5[%c7_7] : memref<18xf32, #tpu.memory_space<smem>>
    %c8_8 = arith.constant 8 : index
    %80 = memref.load %arg5[%c8_8] : memref<18xf32, #tpu.memory_space<smem>>
    %c9_9 = arith.constant 9 : index
    %81 = memref.load %arg5[%c9_9] : memref<18xf32, #tpu.memory_space<smem>>
    %c10_10 = arith.constant 10 : index
    %82 = memref.load %arg5[%c10_10] : memref<18xf32, #tpu.memory_space<smem>>
    %c11_11 = arith.constant 11 : index
    %83 = memref.load %arg5[%c11_11] : memref<18xf32, #tpu.memory_space<smem>>
    %c12_12 = arith.constant 12 : index
    %84 = memref.load %arg5[%c12_12] : memref<18xf32, #tpu.memory_space<smem>>
    %c13_13 = arith.constant 13 : index
    %85 = memref.load %arg5[%c13_13] : memref<18xf32, #tpu.memory_space<smem>>
    %c14_14 = arith.constant 14 : index
    %86 = memref.load %arg5[%c14_14] : memref<18xf32, #tpu.memory_space<smem>>
    %c15_15 = arith.constant 15 : index
    %87 = memref.load %arg5[%c15_15] : memref<18xf32, #tpu.memory_space<smem>>
    %c16_16 = arith.constant 16 : index
    %88 = memref.load %arg5[%c16_16] : memref<18xf32, #tpu.memory_space<smem>>
    %c17_17 = arith.constant 17 : index
    %89 = memref.load %arg5[%c17_17] : memref<18xf32, #tpu.memory_space<smem>>
    %c0_i32 = arith.constant 0 : i32
    %c16_i32 = arith.constant 16 : i32
    %90 = arith.muli %c0_i32, %c16_i32 : i32
    %91 = tpu.assume_multiple %90, 16 : i32
    %c0_18 = arith.constant 0 : index
    %c3_19 = arith.constant 3 : index
    %92 = arith.index_cast %91 : i32 to index
    %c0_20 = arith.constant 0 : index
    %93 = vector.load %arg2[%c0_18, %c3_19, %92, %c0_20] : memref<1x9x16x128xf32, #tpu.memory_space<vmem>>, vector<1x1x16x128xf32>
    %94 = vector.shape_cast %93 : vector<1x1x16x128xf32> to vector<16x128xf32>
    %c0_21 = arith.constant 0 : index
    %c4_22 = arith.constant 4 : index
    %95 = arith.index_cast %91 : i32 to index
    %c0_23 = arith.constant 0 : index
    %96 = vector.load %arg2[%c0_21, %c4_22, %95, %c0_23] : memref<1x9x16x128xf32, #tpu.memory_space<vmem>>, vector<1x1x16x128xf32>
    %97 = vector.shape_cast %96 : vector<1x1x16x128xf32> to vector<16x128xf32>
    %c0_24 = arith.constant 0 : index
    %c5_25 = arith.constant 5 : index
    %98 = arith.index_cast %91 : i32 to index
    %c0_26 = arith.constant 0 : index
    %99 = vector.load %arg2[%c0_24, %c5_25, %98, %c0_26] : memref<1x9x16x128xf32, #tpu.memory_space<vmem>>, vector<1x1x16x128xf32>
    %100 = vector.shape_cast %99 : vector<1x1x16x128xf32> to vector<16x128xf32>
    %c0_27 = arith.constant 0 : index
    %c6_28 = arith.constant 6 : index
    %101 = arith.index_cast %91 : i32 to index
    %c0_29 = arith.constant 0 : index
    %102 = vector.load %arg2[%c0_27, %c6_28, %101, %c0_29] : memref<1x9x16x128xf32, #tpu.memory_space<vmem>>, vector<1x1x16x128xf32>
    %103 = vector.shape_cast %102 : vector<1x1x16x128xf32> to vector<16x128xf32>
    %c0_30 = arith.constant 0 : index
    %c7_31 = arith.constant 7 : index
    %104 = arith.index_cast %91 : i32 to index
    %c0_32 = arith.constant 0 : index
    %105 = vector.load %arg2[%c0_30, %c7_31, %104, %c0_32] : memref<1x9x16x128xf32, #tpu.memory_space<vmem>>, vector<1x1x16x128xf32>
    %106 = vector.shape_cast %105 : vector<1x1x16x128xf32> to vector<16x128xf32>
    %c0_33 = arith.constant 0 : index
    %c8_34 = arith.constant 8 : index
    %107 = arith.index_cast %91 : i32 to index
    %c0_35 = arith.constant 0 : index
    %108 = vector.load %arg2[%c0_33, %c8_34, %107, %c0_35] : memref<1x9x16x128xf32, #tpu.memory_space<vmem>>, vector<1x1x16x128xf32>
    %109 = vector.shape_cast %108 : vector<1x1x16x128xf32> to vector<16x128xf32>
    %c0_36 = arith.constant 0 : index
    %c0_37 = arith.constant 0 : index
    %110 = arith.index_cast %91 : i32 to index
    %c0_38 = arith.constant 0 : index
    %111 = vector.load %arg3[%c0_36, %c0_37, %110, %c0_38] : memref<1x6x16x128xf32, #tpu.memory_space<vmem>>, vector<1x1x16x128xf32>
    %112 = vector.shape_cast %111 : vector<1x1x16x128xf32> to vector<16x128xf32>
    %c0_39 = arith.constant 0 : index
    %c1_40 = arith.constant 1 : index
    %113 = arith.index_cast %91 : i32 to index
    %c0_41 = arith.constant 0 : index
    %114 = vector.load %arg3[%c0_39, %c1_40, %113, %c0_41] : memref<1x6x16x128xf32, #tpu.memory_space<vmem>>, vector<1x1x16x128xf32>
    %115 = vector.shape_cast %114 : vector<1x1x16x128xf32> to vector<16x128xf32>
    %c0_42 = arith.constant 0 : index
    %c2_43 = arith.constant 2 : index
    %116 = arith.index_cast %91 : i32 to index
    %c0_44 = arith.constant 0 : index
    %117 = vector.load %arg3[%c0_42, %c2_43, %116, %c0_44] : memref<1x6x16x128xf32, #tpu.memory_space<vmem>>, vector<1x1x16x128xf32>
    %118 = vector.shape_cast %117 : vector<1x1x16x128xf32> to vector<16x128xf32>
    %c0_45 = arith.constant 0 : index
    %c3_46 = arith.constant 3 : index
    %119 = arith.index_cast %91 : i32 to index
    %c0_47 = arith.constant 0 : index
    %120 = vector.load %arg3[%c0_45, %c3_46, %119, %c0_47] : memref<1x6x16x128xf32, #tpu.memory_space<vmem>>, vector<1x1x16x128xf32>
    %121 = vector.shape_cast %120 : vector<1x1x16x128xf32> to vector<16x128xf32>
    %c0_48 = arith.constant 0 : index
    %c4_49 = arith.constant 4 : index
    %122 = arith.index_cast %91 : i32 to index
    %c0_50 = arith.constant 0 : index
    %123 = vector.load %arg3[%c0_48, %c4_49, %122, %c0_50] : memref<1x6x16x128xf32, #tpu.memory_space<vmem>>, vector<1x1x16x128xf32>
    %124 = vector.shape_cast %123 : vector<1x1x16x128xf32> to vector<16x128xf32>
    %c0_51 = arith.constant 0 : index
    %c5_52 = arith.constant 5 : index
    %125 = arith.index_cast %91 : i32 to index
    %c0_53 = arith.constant 0 : index
    %126 = vector.load %arg3[%c0_51, %c5_52, %125, %c0_53] : memref<1x6x16x128xf32, #tpu.memory_space<vmem>>, vector<1x1x16x128xf32>
    %127 = vector.shape_cast %126 : vector<1x1x16x128xf32> to vector<16x128xf32>
    %128 = vector.broadcast %0 : f32 to vector<16x128xf32>
    %129 = arith.mulf %94, %128 : vector<16x128xf32>
    %130 = vector.broadcast %1 : f32 to vector<16x128xf32>
    %131 = arith.mulf %97, %130 : vector<16x128xf32>
    %132 = arith.addf %129, %131 : vector<16x128xf32>
    %133 = vector.broadcast %2 : f32 to vector<16x128xf32>
    %134 = arith.mulf %100, %133 : vector<16x128xf32>
    %135 = arith.addf %132, %134 : vector<16x128xf32>
    %136 = vector.broadcast %3 : f32 to vector<16x128xf32>
    %137 = arith.mulf %103, %136 : vector<16x128xf32>
    %138 = arith.addf %135, %137 : vector<16x128xf32>
    %139 = vector.broadcast %4 : f32 to vector<16x128xf32>
    %140 = arith.mulf %106, %139 : vector<16x128xf32>
    %141 = arith.addf %138, %140 : vector<16x128xf32>
    %142 = vector.broadcast %5 : f32 to vector<16x128xf32>
    %143 = arith.mulf %109, %142 : vector<16x128xf32>
    %144 = arith.addf %141, %143 : vector<16x128xf32>
    %145 = vector.broadcast %6 : f32 to vector<16x128xf32>
    %146 = arith.mulf %112, %145 : vector<16x128xf32>
    %147 = arith.addf %144, %146 : vector<16x128xf32>
    %148 = vector.broadcast %7 : f32 to vector<16x128xf32>
    %149 = arith.mulf %115, %148 : vector<16x128xf32>
    %150 = arith.addf %147, %149 : vector<16x128xf32>
    %151 = vector.broadcast %8 : f32 to vector<16x128xf32>
    %152 = arith.mulf %118, %151 : vector<16x128xf32>
    %153 = arith.addf %150, %152 : vector<16x128xf32>
    %154 = vector.broadcast %9 : f32 to vector<16x128xf32>
    %155 = arith.mulf %121, %154 : vector<16x128xf32>
    %156 = arith.addf %153, %155 : vector<16x128xf32>
    %157 = vector.broadcast %10 : f32 to vector<16x128xf32>
    %158 = arith.mulf %124, %157 : vector<16x128xf32>
    %159 = arith.addf %156, %158 : vector<16x128xf32>
    %160 = vector.broadcast %11 : f32 to vector<16x128xf32>
    %161 = arith.mulf %127, %160 : vector<16x128xf32>
    %162 = arith.addf %159, %161 : vector<16x128xf32>
    %cst = arith.constant 0.000000e+00 : f32
    %163 = vector.broadcast %cst : f32 to vector<16x128xf32>
    %164 = arith.maximumf %162, %163 : vector<16x128xf32>
    %165 = vector.broadcast %12 : f32 to vector<16x128xf32>
    %166 = arith.mulf %94, %165 : vector<16x128xf32>
    %167 = vector.broadcast %13 : f32 to vector<16x128xf32>
    %168 = arith.mulf %97, %167 : vector<16x128xf32>
    %169 = arith.addf %166, %168 : vector<16x128xf32>
    %170 = vector.broadcast %14 : f32 to vector<16x128xf32>
    %171 = arith.mulf %100, %170 : vector<16x128xf32>
    %172 = arith.addf %169, %171 : vector<16x128xf32>
    %173 = vector.broadcast %15 : f32 to vector<16x128xf32>
    %174 = arith.mulf %103, %173 : vector<16x128xf32>
    %175 = arith.addf %172, %174 : vector<16x128xf32>
    %176 = vector.broadcast %16 : f32 to vector<16x128xf32>
    %177 = arith.mulf %106, %176 : vector<16x128xf32>
    %178 = arith.addf %175, %177 : vector<16x128xf32>
    %179 = vector.broadcast %17 : f32 to vector<16x128xf32>
    %180 = arith.mulf %109, %179 : vector<16x128xf32>
    %181 = arith.addf %178, %180 : vector<16x128xf32>
    %182 = vector.broadcast %18 : f32 to vector<16x128xf32>
    %183 = arith.mulf %112, %182 : vector<16x128xf32>
    %184 = arith.addf %181, %183 : vector<16x128xf32>
    %185 = vector.broadcast %19 : f32 to vector<16x128xf32>
    %186 = arith.mulf %115, %185 : vector<16x128xf32>
    %187 = arith.addf %184, %186 : vector<16x128xf32>
    %188 = vector.broadcast %20 : f32 to vector<16x128xf32>
    %189 = arith.mulf %118, %188 : vector<16x128xf32>
    %190 = arith.addf %187, %189 : vector<16x128xf32>
    %191 = vector.broadcast %21 : f32 to vector<16x128xf32>
    %192 = arith.mulf %121, %191 : vector<16x128xf32>
    %193 = arith.addf %190, %192 : vector<16x128xf32>
    %194 = vector.broadcast %22 : f32 to vector<16x128xf32>
    %195 = arith.mulf %124, %194 : vector<16x128xf32>
    %196 = arith.addf %193, %195 : vector<16x128xf32>
    %197 = vector.broadcast %23 : f32 to vector<16x128xf32>
    %198 = arith.mulf %127, %197 : vector<16x128xf32>
    %199 = arith.addf %196, %198 : vector<16x128xf32>
    %cst_54 = arith.constant 0.000000e+00 : f32
    %200 = vector.broadcast %cst_54 : f32 to vector<16x128xf32>
    %201 = arith.maximumf %199, %200 : vector<16x128xf32>
    %202 = vector.broadcast %24 : f32 to vector<16x128xf32>
    %203 = arith.mulf %94, %202 : vector<16x128xf32>
    %204 = vector.broadcast %25 : f32 to vector<16x128xf32>
    %205 = arith.mulf %97, %204 : vector<16x128xf32>
    %206 = arith.addf %203, %205 : vector<16x128xf32>
    %207 = vector.broadcast %26 : f32 to vector<16x128xf32>
    %208 = arith.mulf %100, %207 : vector<16x128xf32>
    %209 = arith.addf %206, %208 : vector<16x128xf32>
    %210 = vector.broadcast %27 : f32 to vector<16x128xf32>
    %211 = arith.mulf %103, %210 : vector<16x128xf32>
    %212 = arith.addf %209, %211 : vector<16x128xf32>
    %213 = vector.broadcast %28 : f32 to vector<16x128xf32>
    %214 = arith.mulf %106, %213 : vector<16x128xf32>
    %215 = arith.addf %212, %214 : vector<16x128xf32>
    %216 = vector.broadcast %29 : f32 to vector<16x128xf32>
    %217 = arith.mulf %109, %216 : vector<16x128xf32>
    %218 = arith.addf %215, %217 : vector<16x128xf32>
    %219 = vector.broadcast %30 : f32 to vector<16x128xf32>
    %220 = arith.mulf %112, %219 : vector<16x128xf32>
    %221 = arith.addf %218, %220 : vector<16x128xf32>
    %222 = vector.broadcast %31 : f32 to vector<16x128xf32>
    %223 = arith.mulf %115, %222 : vector<16x128xf32>
    %224 = arith.addf %221, %223 : vector<16x128xf32>
    %225 = vector.broadcast %32 : f32 to vector<16x128xf32>
    %226 = arith.mulf %118, %225 : vector<16x128xf32>
    %227 = arith.addf %224, %226 : vector<16x128xf32>
    %228 = vector.broadcast %33 : f32 to vector<16x128xf32>
    %229 = arith.mulf %121, %228 : vector<16x128xf32>
    %230 = arith.addf %227, %229 : vector<16x128xf32>
    %231 = vector.broadcast %34 : f32 to vector<16x128xf32>
    %232 = arith.mulf %124, %231 : vector<16x128xf32>
    %233 = arith.addf %230, %232 : vector<16x128xf32>
    %234 = vector.broadcast %35 : f32 to vector<16x128xf32>
    %235 = arith.mulf %127, %234 : vector<16x128xf32>
    %236 = arith.addf %233, %235 : vector<16x128xf32>
    %cst_55 = arith.constant 0.000000e+00 : f32
    %237 = vector.broadcast %cst_55 : f32 to vector<16x128xf32>
    %238 = arith.maximumf %236, %237 : vector<16x128xf32>
    %239 = vector.broadcast %36 : f32 to vector<16x128xf32>
    %240 = arith.mulf %94, %239 : vector<16x128xf32>
    %241 = vector.broadcast %37 : f32 to vector<16x128xf32>
    %242 = arith.mulf %97, %241 : vector<16x128xf32>
    %243 = arith.addf %240, %242 : vector<16x128xf32>
    %244 = vector.broadcast %38 : f32 to vector<16x128xf32>
    %245 = arith.mulf %100, %244 : vector<16x128xf32>
    %246 = arith.addf %243, %245 : vector<16x128xf32>
    %247 = vector.broadcast %39 : f32 to vector<16x128xf32>
    %248 = arith.mulf %103, %247 : vector<16x128xf32>
    %249 = arith.addf %246, %248 : vector<16x128xf32>
    %250 = vector.broadcast %40 : f32 to vector<16x128xf32>
    %251 = arith.mulf %106, %250 : vector<16x128xf32>
    %252 = arith.addf %249, %251 : vector<16x128xf32>
    %253 = vector.broadcast %41 : f32 to vector<16x128xf32>
    %254 = arith.mulf %109, %253 : vector<16x128xf32>
    %255 = arith.addf %252, %254 : vector<16x128xf32>
    %256 = vector.broadcast %42 : f32 to vector<16x128xf32>
    %257 = arith.mulf %112, %256 : vector<16x128xf32>
    %258 = arith.addf %255, %257 : vector<16x128xf32>
    %259 = vector.broadcast %43 : f32 to vector<16x128xf32>
    %260 = arith.mulf %115, %259 : vector<16x128xf32>
    %261 = arith.addf %258, %260 : vector<16x128xf32>
    %262 = vector.broadcast %44 : f32 to vector<16x128xf32>
    %263 = arith.mulf %118, %262 : vector<16x128xf32>
    %264 = arith.addf %261, %263 : vector<16x128xf32>
    %265 = vector.broadcast %45 : f32 to vector<16x128xf32>
    %266 = arith.mulf %121, %265 : vector<16x128xf32>
    %267 = arith.addf %264, %266 : vector<16x128xf32>
    %268 = vector.broadcast %46 : f32 to vector<16x128xf32>
    %269 = arith.mulf %124, %268 : vector<16x128xf32>
    %270 = arith.addf %267, %269 : vector<16x128xf32>
    %271 = vector.broadcast %47 : f32 to vector<16x128xf32>
    %272 = arith.mulf %127, %271 : vector<16x128xf32>
    %273 = arith.addf %270, %272 : vector<16x128xf32>
    %cst_56 = arith.constant 0.000000e+00 : f32
    %274 = vector.broadcast %cst_56 : f32 to vector<16x128xf32>
    %275 = arith.maximumf %273, %274 : vector<16x128xf32>
    %276 = vector.broadcast %48 : f32 to vector<16x128xf32>
    %277 = arith.mulf %94, %276 : vector<16x128xf32>
    %278 = vector.broadcast %49 : f32 to vector<16x128xf32>
    %279 = arith.mulf %97, %278 : vector<16x128xf32>
    %280 = arith.addf %277, %279 : vector<16x128xf32>
    %281 = vector.broadcast %50 : f32 to vector<16x128xf32>
    %282 = arith.mulf %100, %281 : vector<16x128xf32>
    %283 = arith.addf %280, %282 : vector<16x128xf32>
    %284 = vector.broadcast %51 : f32 to vector<16x128xf32>
    %285 = arith.mulf %103, %284 : vector<16x128xf32>
    %286 = arith.addf %283, %285 : vector<16x128xf32>
    %287 = vector.broadcast %52 : f32 to vector<16x128xf32>
    %288 = arith.mulf %106, %287 : vector<16x128xf32>
    %289 = arith.addf %286, %288 : vector<16x128xf32>
    %290 = vector.broadcast %53 : f32 to vector<16x128xf32>
    %291 = arith.mulf %109, %290 : vector<16x128xf32>
    %292 = arith.addf %289, %291 : vector<16x128xf32>
    %293 = vector.broadcast %54 : f32 to vector<16x128xf32>
    %294 = arith.mulf %112, %293 : vector<16x128xf32>
    %295 = arith.addf %292, %294 : vector<16x128xf32>
    %296 = vector.broadcast %55 : f32 to vector<16x128xf32>
    %297 = arith.mulf %115, %296 : vector<16x128xf32>
    %298 = arith.addf %295, %297 : vector<16x128xf32>
    %299 = vector.broadcast %56 : f32 to vector<16x128xf32>
    %300 = arith.mulf %118, %299 : vector<16x128xf32>
    %301 = arith.addf %298, %300 : vector<16x128xf32>
    %302 = vector.broadcast %57 : f32 to vector<16x128xf32>
    %303 = arith.mulf %121, %302 : vector<16x128xf32>
    %304 = arith.addf %301, %303 : vector<16x128xf32>
    %305 = vector.broadcast %58 : f32 to vector<16x128xf32>
    %306 = arith.mulf %124, %305 : vector<16x128xf32>
    %307 = arith.addf %304, %306 : vector<16x128xf32>
    %308 = vector.broadcast %59 : f32 to vector<16x128xf32>
    %309 = arith.mulf %127, %308 : vector<16x128xf32>
    %310 = arith.addf %307, %309 : vector<16x128xf32>
    %cst_57 = arith.constant 0.000000e+00 : f32
    %311 = vector.broadcast %cst_57 : f32 to vector<16x128xf32>
    %312 = arith.maximumf %310, %311 : vector<16x128xf32>
    %313 = vector.broadcast %60 : f32 to vector<16x128xf32>
    %314 = arith.mulf %94, %313 : vector<16x128xf32>
    %315 = vector.broadcast %61 : f32 to vector<16x128xf32>
    %316 = arith.mulf %97, %315 : vector<16x128xf32>
    %317 = arith.addf %314, %316 : vector<16x128xf32>
    %318 = vector.broadcast %62 : f32 to vector<16x128xf32>
    %319 = arith.mulf %100, %318 : vector<16x128xf32>
    %320 = arith.addf %317, %319 : vector<16x128xf32>
    %321 = vector.broadcast %63 : f32 to vector<16x128xf32>
    %322 = arith.mulf %103, %321 : vector<16x128xf32>
    %323 = arith.addf %320, %322 : vector<16x128xf32>
    %324 = vector.broadcast %64 : f32 to vector<16x128xf32>
    %325 = arith.mulf %106, %324 : vector<16x128xf32>
    %326 = arith.addf %323, %325 : vector<16x128xf32>
    %327 = vector.broadcast %65 : f32 to vector<16x128xf32>
    %328 = arith.mulf %109, %327 : vector<16x128xf32>
    %329 = arith.addf %326, %328 : vector<16x128xf32>
    %330 = vector.broadcast %66 : f32 to vector<16x128xf32>
    %331 = arith.mulf %112, %330 : vector<16x128xf32>
    %332 = arith.addf %329, %331 : vector<16x128xf32>
    %333 = vector.broadcast %67 : f32 to vector<16x128xf32>
    %334 = arith.mulf %115, %333 : vector<16x128xf32>
    %335 = arith.addf %332, %334 : vector<16x128xf32>
    %336 = vector.broadcast %68 : f32 to vector<16x128xf32>
    %337 = arith.mulf %118, %336 : vector<16x128xf32>
    %338 = arith.addf %335, %337 : vector<16x128xf32>
    %339 = vector.broadcast %69 : f32 to vector<16x128xf32>
    %340 = arith.mulf %121, %339 : vector<16x128xf32>
    %341 = arith.addf %338, %340 : vector<16x128xf32>
    %342 = vector.broadcast %70 : f32 to vector<16x128xf32>
    %343 = arith.mulf %124, %342 : vector<16x128xf32>
    %344 = arith.addf %341, %343 : vector<16x128xf32>
    %345 = vector.broadcast %71 : f32 to vector<16x128xf32>
    %346 = arith.mulf %127, %345 : vector<16x128xf32>
    %347 = arith.addf %344, %346 : vector<16x128xf32>
    %cst_58 = arith.constant 0.000000e+00 : f32
    %348 = vector.broadcast %cst_58 : f32 to vector<16x128xf32>
    %349 = arith.maximumf %347, %348 : vector<16x128xf32>
    %350 = vector.broadcast %72 : f32 to vector<16x128xf32>
    %351 = arith.mulf %164, %350 : vector<16x128xf32>
    %352 = vector.broadcast %73 : f32 to vector<16x128xf32>
    %353 = arith.mulf %201, %352 : vector<16x128xf32>
    %354 = arith.addf %351, %353 : vector<16x128xf32>
    %355 = vector.broadcast %74 : f32 to vector<16x128xf32>
    %356 = arith.mulf %238, %355 : vector<16x128xf32>
    %357 = arith.addf %354, %356 : vector<16x128xf32>
    %358 = vector.broadcast %75 : f32 to vector<16x128xf32>
    %359 = arith.mulf %275, %358 : vector<16x128xf32>
    %360 = arith.addf %357, %359 : vector<16x128xf32>
    %361 = vector.broadcast %76 : f32 to vector<16x128xf32>
    %362 = arith.mulf %312, %361 : vector<16x128xf32>
    %363 = arith.addf %360, %362 : vector<16x128xf32>
    %364 = vector.broadcast %77 : f32 to vector<16x128xf32>
    %365 = arith.mulf %349, %364 : vector<16x128xf32>
    %366 = arith.addf %363, %365 : vector<16x128xf32>
    %c0_59 = arith.constant 0 : index
    %c0_60 = arith.constant 0 : index
    %367 = arith.index_cast %91 : i32 to index
    %c0_61 = arith.constant 0 : index
    %368 = vector.load %arg2[%c0_59, %c0_60, %367, %c0_61] : memref<1x9x16x128xf32, #tpu.memory_space<vmem>>, vector<1x1x16x128xf32>
    %369 = vector.shape_cast %368 : vector<1x1x16x128xf32> to vector<16x128xf32>
    %370 = arith.addf %369, %366 : vector<16x128xf32>
    %c0_62 = arith.constant 0 : index
    %c0_63 = arith.constant 0 : index
    %371 = arith.index_cast %91 : i32 to index
    %c0_64 = arith.constant 0 : index
    %372 = vector.load %arg6[%c0_62, %c0_63, %371, %c0_64] : memref<1x3x16x128xf32, #tpu.memory_space<vmem>>, vector<1x1x16x128xf32>
    %373 = vector.shape_cast %372 : vector<1x1x16x128xf32> to vector<16x128xf32>
    %374 = vector.shape_cast %370 : vector<16x128xf32> to vector<1x1x16x128xf32>
    tpu.vector_store %arg6[%c0_62, %c0_63, %371, %c0_64], %374 {strides = array<i32>} : memref<1x3x16x128xf32, #tpu.memory_space<vmem>>, vector<1x1x16x128xf32>,
    %375 = vector.broadcast %78 : f32 to vector<16x128xf32>
    %376 = arith.mulf %164, %375 : vector<16x128xf32>
    %377 = vector.broadcast %79 : f32 to vector<16x128xf32>
    %378 = arith.mulf %201, %377 : vector<16x128xf32>
    %379 = arith.addf %376, %378 : vector<16x128xf32>
    %380 = vector.broadcast %80 : f32 to vector<16x128xf32>
    %381 = arith.mulf %238, %380 : vector<16x128xf32>
    %382 = arith.addf %379, %381 : vector<16x128xf32>
    %383 = vector.broadcast %81 : f32 to vector<16x128xf32>
    %384 = arith.mulf %275, %383 : vector<16x128xf32>
    %385 = arith.addf %382, %384 : vector<16x128xf32>
    %386 = vector.broadcast %82 : f32 to vector<16x128xf32>
    %387 = arith.mulf %312, %386 : vector<16x128xf32>
    %388 = arith.addf %385, %387 : vector<16x128xf32>
    %389 = vector.broadcast %83 : f32 to vector<16x128xf32>
    %390 = arith.mulf %349, %389 : vector<16x128xf32>
    %391 = arith.addf %388, %390 : vector<16x128xf32>
    %c0_65 = arith.constant 0 : index
    %c1_66 = arith.constant 1 : index
    %392 = arith.index_cast %91 : i32 to index
    %c0_67 = arith.constant 0 : index
    %393 = vector.load %arg2[%c0_65, %c1_66, %392, %c0_67] : memref<1x9x16x128xf32, #tpu.memory_space<vmem>>, vector<1x1x16x128xf32>
    %394 = vector.shape_cast %393 : vector<1x1x16x128xf32> to vector<16x128xf32>
    %395 = arith.addf %394, %391 : vector<16x128xf32>
    %c0_68 = arith.constant 0 : index
    %c1_69 = arith.constant 1 : index
    %396 = arith.index_cast %91 : i32 to index
    %c0_70 = arith.constant 0 : index
    %397 = vector.load %arg6[%c0_68, %c1_69, %396, %c0_70] : memref<1x3x16x128xf32, #tpu.memory_space<vmem>>, vector<1x1x16x128xf32>
    %398 = vector.shape_cast %397 : vector<1x1x16x128xf32> to vector<16x128xf32>
    %399 = vector.shape_cast %395 : vector<16x128xf32> to vector<1x1x16x128xf32>
    tpu.vector_store %arg6[%c0_68, %c1_69, %396, %c0_70], %399 {strides = array<i32>} : memref<1x3x16x128xf32, #tpu.memory_space<vmem>>, vector<1x1x16x128xf32>,
    %400 = vector.broadcast %84 : f32 to vector<16x128xf32>
    %401 = arith.mulf %164, %400 : vector<16x128xf32>
    %402 = vector.broadcast %85 : f32 to vector<16x128xf32>
    %403 = arith.mulf %201, %402 : vector<16x128xf32>
    %404 = arith.addf %401, %403 : vector<16x128xf32>
    %405 = vector.broadcast %86 : f32 to vector<16x128xf32>
    %406 = arith.mulf %238, %405 : vector<16x128xf32>
    %407 = arith.addf %404, %406 : vector<16x128xf32>
    %408 = vector.broadcast %87 : f32 to vector<16x128xf32>
    %409 = arith.mulf %275, %408 : vector<16x128xf32>
    %410 = arith.addf %407, %409 : vector<16x128xf32>
    %411 = vector.broadcast %88 : f32 to vector<16x128xf32>
    %412 = arith.mulf %312, %411 : vector<16x128xf32>
    %413 = arith.addf %410, %412 : vector<16x128xf32>
    %414 = vector.broadcast %89 : f32 to vector<16x128xf32>
    %415 = arith.mulf %349, %414 : vector<16x128xf32>
    %416 = arith.addf %413, %415 : vector<16x128xf32>
    %c0_71 = arith.constant 0 : index
    %c2_72 = arith.constant 2 : index
    %417 = arith.index_cast %91 : i32 to index
    %c0_73 = arith.constant 0 : index
    %418 = vector.load %arg2[%c0_71, %c2_72, %417, %c0_73] : memref<1x9x16x128xf32, #tpu.memory_space<vmem>>, vector<1x1x16x128xf32>
    %419 = vector.shape_cast %418 : vector<1x1x16x128xf32> to vector<16x128xf32>
    %420 = arith.addf %419, %416 : vector<16x128xf32>
    %c0_74 = arith.constant 0 : index
    %c2_75 = arith.constant 2 : index
    %421 = arith.index_cast %91 : i32 to index
    %c0_76 = arith.constant 0 : index
    %422 = vector.load %arg6[%c0_74, %c2_75, %421, %c0_76] : memref<1x3x16x128xf32, #tpu.memory_space<vmem>>, vector<1x1x16x128xf32>
    %423 = vector.shape_cast %422 : vector<1x1x16x128xf32> to vector<16x128xf32>
    %424 = vector.shape_cast %420 : vector<16x128xf32> to vector<1x1x16x128xf32>
    tpu.vector_store %arg6[%c0_74, %c2_75, %421, %c0_76], %424 {strides = array<i32>} : memref<1x3x16x128xf32, #tpu.memory_space<vmem>>, vector<1x1x16x128xf32>,
    %c1_i32 = arith.constant 1 : i32
    return
  }
  func.func @transform_0(%arg0: i32, %arg1: i32) -> (i32, i32, i32, i32) {
    %c0_i32 = arith.constant 0 : i32
    %c0_i32_0 = arith.constant 0 : i32
    %c0_i32_1 = arith.constant 0 : i32
    return %arg0, %c0_i32, %arg1, %c0_i32_0 : i32, i32, i32, i32
  }
  func.func @transform_1(%arg0: i32, %arg1: i32) -> (i32, i32, i32, i32) {
    %c0_i32 = arith.constant 0 : i32
    %c0_i32_0 = arith.constant 0 : i32
    %c0_i32_1 = arith.constant 0 : i32
    return %arg0, %c0_i32, %arg1, %c0_i32_0 : i32, i32, i32, i32
  }
  func.func @transform_2(%arg0: i32, %arg1: i32) -> i32 {
    %c0_i32 = arith.constant 0 : i32
    %c0_i32_0 = arith.constant 0 : i32
    return %c0_i32 : i32
  }
  func.func @transform_3(%arg0: i32, %arg1: i32) -> i32 {
    %c0_i32 = arith.constant 0 : i32
    %c0_i32_0 = arith.constant 0 : i32
    return %c0_i32 : i32
  }
  func.func @transform_4(%arg0: i32, %arg1: i32) -> (i32, i32, i32, i32) {
    %c0_i32 = arith.constant 0 : i32
    %c0_i32_0 = arith.constant 0 : i32
    %c0_i32_1 = arith.constant 0 : i32
    return %arg0, %c0_i32, %arg1, %c0_i32_0 : i32, i32, i32, i32
  }
}

</mosaic_0001>

<bundles_post_ra>
// kernel: tpu_custom_call.1
= control target key start
LH: loop header
LB: loop body
LE: loop exit
PB: predicated region body
PF: predicated region fallthrough
CT: control target
= control target key end

     0   :  { %s2339_s0 = inlined_call_operand.hbm [shape: f32[2,9,16,128], index: 0, kind: input, shape index: {}]   ;;  %s2340_s1 = inlined_call_operand.hbm [shape: f32[2,6,16,128], index: 1, kind: input, shape index: {}]   ;;  %s2341_s2 = inlined_call_operand.vmem [shape: f32[72], index: 2, kind: input, shape index: {}]   ;;  %s2342_s3 = inlined_call_operand.vmem [shape: f32[18], index: 3, kind: input, shape index: {}]   ;;  %s2343_s4 = inlined_call_operand.hbm [shape: f32[2,3,16,128], index: 4, kind: output, shape index: {}]  }
   0x1   :  { %2350 = sst [smem:[#allocation17_spill]] %s2339_s0 }
   0x2   :  { %2351 = sst [smem:[#allocation18_spill]] %s2341_s2 }
   0x3   :  { %2352 = sst [smem:[#allocation19_spill]] %s2342_s3 }
   0x4   :  { %9 = vsyncpa [#allocation3], 0 }
   0x5   :  { %11 = vsyncpa [#allocation3 + $0x1], 0 }
   0x6   :  { %12 = vsyncpa [#allocation7], 0 }
   0x7   :  { %14 = vsyncpa [#allocation7 + $0x1], 0 }
   0x8   :  { %15 = vsyncpa [#allocation5], 0 }
   0x9   :  { %16 = vsyncpa [#allocation10], 0 }
   0xa   :  { %17 = vsyncpa [#allocation4], 0 }
   0xb   :  { %19 = vsyncpa [#allocation4 + $0x1], 0  ;;  %s1525_s15 = smov 0   ;;  %s1527_s16 = smov 0  }
   0xc   :  { %s1529_s17 = smov 0   ;;  %s1531_s18 = smov 0  }
   0xd   :  { %s1533_s19 = smov 0   ;;  %s1535_s20 = smov 0  }
   0xe LB: > { %s1073_s21 = sadd.s32 4294967295, %s1489_s20   ;;  %s1074_s22 = sadd.s32 4294967294, %s1489_s20   ;;  %s1489_s20 = sphi %s1535_s20, %s25_s20   ;;  %s1485_s19 = sphi %s1533_s19, %s2375_s19   ;;  %s1481_s18 = sphi %s1531_s18, %s2374_s18   ;;  %s1477_s17 = sphi %s1529_s17, %s2373_s17   ;;  %s1473_s16 = sphi %s1527_s16, %s2372_s16   ;;  %s1469_s15 = sphi %s1525_s15, %s2371_s15  }
   0xf   : > { %s46_s23 = sadd.s32 1, %s1477_s17  ;;  %p53_p0 = scmp.ne.s32.totalorder %s1477_s17, %s1473_s16 }
  0x10   : > { %p54_p1 = scmp.eq.s32.totalorder %s1489_s20, 0  ;;  %p59_p2 = scmp.ne.s32.totalorder %s1473_s16, %s1469_s15 }
  0x11   : > { %p1563_p3 = scmp.eq.s32.totalorder %s1073_s21, 0  ;;  %p155_p4 = scmp.eq.s32.totalorder %s1073_s21, 1 }
  0x12   : > { %p1567_p5 = por %p54_p1, %p53_p0  ;;  %p161_p6 = scmp.eq.s32.totalorder %s1074_s22, 1 }
  0x13   : > { %s2353_s24 = scalar_select %p1563_p3, 1, 0 }
  0x14   : > { %p1573_p7 = por %p1563_p3, %p59_p2  ;;  %p1577_p8 = por %p155_p4, %p53_p0 }
  0x15   : > { %p1581_p9 = por %p161_p6, %p59_p2  ;;  %p1075_p10 = scmp.ge.s32.totalorder %s1489_s20, 1 }
  0x16   : > { %s2355_s26 = scalar_select %p1573_p7, 1, 0 }
  0x17   : > { %s2356_s27 = scalar_select %p1577_p8, 1, 0 }
  0x18   : > { %s2357_s28 = scalar_select %p1581_p9, 1, 0 }
  0x19   : > { %p168_p11 = scmp.lt.s32.totalorder %s1489_s20, 3  ;;  %s2358_s2 = sld [smem:[#allocation18_spill]] }
  0x1a   : > { %p1247_p0 = scmp.lt.s32.totalorder %s1489_s20, 2  ;;  %s2360_s3 = sld [smem:[#allocation19_spill]] }
  0x1b   : > { %p1590_p12 = pnand %p1075_p10, %p168_p11 }
  0x1c   : > { %p1603_p2 = pnand %p1247_p0, %p1567_p5 }
  0x1d   : > { %s2359_s6 = scalar_select %p1590_p12, 1, 0 }
  0x1e   : > { %p1227_p1 = pneg %p1590_p12 }
  0x1f   : > { %s181_s5 = sshll.u32 %s2358_s2, 4  ;;  %s182_s5 = int_to_ptr.vmem [resolvable:$true] %s181_s5 }
  0x20   : > { %s192_s9 = sshll.u32 %s2360_s3, 4  ;;  %p1609_p4 = pnand %p1227_p1, %p1563_p3  ;;  %s193_s9 = int_to_ptr.vmem [resolvable:$true] %s192_s9 }
  0x21   : > { %s2361_s10 = scalar_select %p1603_p2, 1, 0 }
  0x22   : > { %s1305_s12 = scalar_lea.vmem %s182_s5, 16  ;;  %p1307_p10 = pneg %p1609_p4 }
  0x23   : > { %p1306_p6 = scmp.ne.s32.totalorder %s182_s5, %s1305_s12  ;;  %p1313_p9 = scmp.lt.s32.totalorder %s182_s5, %s182_s5 }
  0x24   : > { %p1314_p8 = scmp.lt.s32.totalorder %s1305_s12, %s1305_s12 }
  0x25   : > { %p1308_p11 = pnand %p1307_p10, %p1306_p6 }
  0x26   : > { %p1315_p7 = por %p1314_p8, %p1313_p9 }
  0x27   : > { %p1309_p13 = pneg %p1308_p11 }
  0x29   : > { %p1316_p5 = pnand %p1315_p7, %p1309_p13 }
  0x2b   : > { %1319 = shalt.err (!%p1316_p5)
}
  0x2c   : > { %s1491_s13 = smov [#allocation8]   ;;  %s1320_s14 = scalar_lea.vmem %s193_s9, 16 }
  0x2d   : > { %1230 = dma.vmem_to_smem (!%p1609_p4), %s182_s5, 16, %s1491_s13, [#allocation5]  }
  0x2e   : > { %p1321_p0 = scmp.ne.s32.totalorder %s193_s9, %s1320_s14  ;;  %p1328_p12 = scmp.lt.s32.totalorder %s193_s9, %s193_s9 }
  0x2f   : > { %p1329_p2 = scmp.lt.s32.totalorder %s1320_s14, %s1320_s14 }
  0x30   : > { %p1323_p1 = pnand %p1321_p0, %p1307_p10 }
  0x31   : > { %p1330_p6 = por %p1329_p2, %p1328_p12 }
  0x32   : > { %p1324_p3 = pneg %p1323_p1 }
  0x34   : > { %p1331_p11 = pnand %p1330_p6, %p1324_p3 }
  0x36   : > { %1334 = shalt.err (!%p1331_p11)
}
  0x37   : > { %s1492_s21 = smov [#allocation9]   ;;  %s37_s22 = sadd.s32 1, %s1485_s19 }
  0x38   : > { %1233 = dma.vmem_to_smem (!%p1609_p4), %s193_s9, 16, %s1492_s21, [#allocation10]  }
  0x39   : > { %s1621_s25 = sand.u32 1, %s1477_s17   ;;  %p39_p7 = scmp.ge.s32.totalorder %s37_s22, 2 }
  0x3a   : > { %s1205_s29 = smul.u32 144, %s1621_s25  ;;  %s2363_s0 = sld [smem:[#allocation17_spill]] }
  0x3b   : > { %s2377_s22 = smov (%p39_p7, %s37_s22), 0  ;;  %s1206_s30 = smul.u32 2304, %s1485_s19 }
  0x3c   : > { %s41_s5 = ssub.s32 %s1485_s19, %s2377_s22  ;;  %s207_s7 = scalar_lea.vmem [#allocation2], %s1205_s29 }
  0x3d   : > { %s216_s8 = sshll.u32 %s207_s7, 4  ;;  %p44_p3 = scmp.eq.s32.totalorder %s41_s5, 0  ;;  %s1634_s8 = int_to_ptr.vmem [resolvable:$true] %s216_s8 }
  0x3e   : > { %s204_s14 = scalar_lea.sflag [#allocation3], %s1621_s25  ;;  %p2364_p9 = scmp.ne.s32.totalorder %s2361_s10, 0 }
  0x3f   : > { %s1639_s13 = scalar_select %p44_p3, %s1477_s17, %s46_s23  }
  0x40   : > { %s1632_s9 = scalar_lea.hbm %s2363_s0, %s1206_s30  ;;  %p1337_p12 = pneg %p2364_p9 }
  0x41   : > { %s1335_s21 = scalar_lea.hbm %s1632_s9, 2304  ;;  %s1340_s5 = scalar_lea.hbm %s2363_s0, 4608 }
  0x42   : > { %p1336_p8 = scmp.ne.s32.totalorder %s1632_s9, %s1335_s21  ;;  %p1341_p4 = scmp.lt.u32.totalorder %s1632_s9, %s2363_s0 }
  0x43   : > { %p1342_p10 = scmp.lt.u32.totalorder %s1340_s5, %s1335_s21  ;;  %p1344_p0 = scmp.lt.u32.totalorder %s1335_s21, %s1632_s9 }
  0x44   : > { %p1338_p13 = pnand %p1337_p12, %p1336_p8 }
  0x45   : > { %p1343_p5 = por %p1342_p10, %p1341_p4 }
  0x46   : > { %p1339_p2 = pneg %p1338_p13 }
  0x47   : > { %p1345_p1 = por %p1344_p0, %p1343_p5 }
  0x49   : > { %p1346_p6 = pnand %p1345_p1, %p1339_p2 }
  0x4b   : > { %1349 = shalt.err (!%p1346_p6)
}
  0x4c   : > { %s1350_s23 = scalar_lea.vmem %s1634_s8, 2304  ;;  %s1493_s12 = smov [#allocation2]  }
  0x4d   : > { %p1351_p11 = scmp.ne.s32.totalorder %s1634_s8, %s1350_s23  ;;  %s1355_s29 = sshll.u32 %s1493_s12, 4  ;;  %s1356_s29 = int_to_ptr.vmem [resolvable:$false] %s1355_s29 }
  0x4e   : > { %s1357_s30 = scalar_lea.vmem %s1356_s29, 4608  ;;  %p1358_p8 = scmp.lt.s32.totalorder %s1634_s8, %s1356_s29 }
  0x4f   : > { %p1353_p7 = pnand %p1351_p11, %p1337_p12  ;;  %p1359_p13 = scmp.lt.s32.totalorder %s1357_s30, %s1350_s23 }
  0x51   : > { %p1354_p3 = pneg %p1353_p7  ;;  %p1360_p4 = por %p1359_p13, %p1358_p8 }
  0x53   : > { %p1361_p10 = pnand %p1360_p4, %p1354_p3 }
  0x55   : > { %1364 = shalt.err (!%p1361_p10)
}
  0x56   : > { %s1494_s21 = smov 128   ;;  %s1495_s5 = smov 8  }
  0x57   : > { %1237 = dma.hbm_to_vmem [thread:$0]  (!%p2364_p9), %s1632_s9, 2304, %s1634_s8, %s204_s14, %s1494_s21, %s1494_s21, %s1495_s5  }
  0x58   : > { %s1207_s7 = smul.u32 96, %s1621_s25  ;;  %s227_s2 = scalar_lea.sflag [#allocation7], %s1621_s25 }
  0x59   : > { %s1208_s11 = smul.u32 1536, %s1485_s19  ;;  %s1370_s14 = scalar_lea.hbm %s2340_s1, 3072 }
  0x5a   : > { %s230_s30 = scalar_lea.vmem [#allocation6], %s1207_s7 }
  0x5b   : > { %s1677_s29 = scalar_lea.hbm %s2340_s1, %s1208_s11  ;;  %s239_s0 = sshll.u32 %s230_s30, 4  ;;  %s1679_s0 = int_to_ptr.vmem [resolvable:$true] %s239_s0 }
  0x5c   : > { %s1365_s3 = scalar_lea.hbm %s1677_s29, 1536  ;;  %p1371_p1 = scmp.lt.u32.totalorder %s1677_s29, %s2340_s1 }
  0x5d   : > { %p1366_p2 = scmp.ne.s32.totalorder %s1677_s29, %s1365_s3  ;;  %p1372_p6 = scmp.lt.u32.totalorder %s1370_s14, %s1365_s3 }
  0x5e   : > { %p1374_p7 = scmp.lt.u32.totalorder %s1365_s3, %s1677_s29 }
  0x5f   : > { %p1368_p5 = pnand %p1366_p2, %p1337_p12  ;;  %p1373_p11 = por %p1372_p6, %p1371_p1 }
  0x61   : > { %p1369_p0 = pneg %p1368_p5  ;;  %p1375_p3 = por %p1374_p7, %p1373_p11 }
  0x63   : > { %p1376_p8 = pnand %p1375_p3, %p1369_p0 }
  0x65   : > { %1379 = shalt.err (!%p1376_p8)
}
  0x66   : > { %s1380_s7 = scalar_lea.vmem %s1679_s0, 1536  ;;  %s1496_s12 = smov [#allocation6]  }
  0x67   : > { %p1381_p13 = scmp.ne.s32.totalorder %s1679_s0, %s1380_s7  ;;  %s1385_s30 = sshll.u32 %s1496_s12, 4  ;;  %s1386_s30 = int_to_ptr.vmem [resolvable:$false] %s1385_s30 }
  0x68   : > { %s1387_s8 = scalar_lea.vmem %s1386_s30, 3072  ;;  %p1388_p2 = scmp.lt.s32.totalorder %s1679_s0, %s1386_s30 }
  0x69   : > { %p1383_p4 = pnand %p1381_p13, %p1337_p12  ;;  %p1389_p5 = scmp.lt.s32.totalorder %s1387_s8, %s1380_s7 }
  0x6b   : > { %p1384_p10 = pneg %p1383_p4  ;;  %p1390_p1 = por %p1389_p5, %p1388_p2 }
  0x6d   : > { %p1391_p6 = pnand %p1390_p1, %p1384_p10 }
  0x6f   : > { %1394 = shalt.err (!%p1391_p6)
}
  0x70   : > { %1240 = dma.hbm_to_vmem [thread:$0]  (!%p2364_p9), %s1677_s29, 1536, %s1679_s0, %s227_s2, %s1494_s21, %s1494_s21, %s1495_s5  }
  0x71   : > { %p2365_p12 = scmp.ne.s32.totalorder %s2359_s6, 0 }
  0x72   : > { %s1713_s3 = sand.u32 (!%p2365_p12), 1, %s1473_s16   ;;  %p2366_p0 = scmp.ne.s32.totalorder (!%p2365_p12), %s2355_s26, 0 }
  0x73   : > { %251 = sbr.rel (%p2365_p12) target bundleno = 275 (0x113), region = 36  ;;  %s254_s14 = scalar_lea.sflag (!%p2365_p12), [#allocation3], %s1713_s3 }
  0x74   : > { %s1209_s9 = smul.u32 (!%p2365_p12), 144, %s1713_s3 }
  0x76   : > { %s1717_s10 = scalar_lea.vmem (!%p2365_p12), [#allocation2], %s1209_s9 }
  0x7a   : > { %1448 = dma.done.wait (%p2366_p0), %s254_s14, 2304  }
  0x7b   : > { %1450 = vsyncadd (%p2366_p0), %s254_s14, 4294964992  ;;  %s1210_s0 = smul.u32 96, %s1713_s3  ;;  %s263_s2 = scalar_lea.sflag [#allocation7], %s1713_s3 }
  0x7d   : > { %s1725_s6 = scalar_lea.vmem [#allocation6], %s1210_s0 }
  0x7e   : > { %1452 = dma.done.wait (%p2366_p0), %s263_s2, 1536  }
  0x7f   : > { %1454 = vsyncadd (%p2366_p0), %s263_s2, 4294965760  ;;  %p2367_p9 = scmp.ne.s32.totalorder %s2353_s24, 0 }
  0x81   : > { %1456 = dma.done.wait (%p2367_p9), [#allocation5], 16  }
  0x82   : > { %1458 = vsyncadd (%p2367_p9), [#allocation5], 4294967280 }
  0x83   : > { %1460 = dma.done.wait (%p2367_p9), [#allocation10], 16  }
  0x84   : > { %1462 = vsyncadd (%p2367_p9), [#allocation10], 4294967280 }
  0x85   : > { %279 = sfence }
  0x86   : > { %s308_s25 = sld [smem:[#allocation8]]  ;;  %s1084_s26 = sld [smem:[#allocation8 + $0x1]]  ;;  %v1746_v0 = vld [vmem:[%s1717_s10 + $0x30] sm:$0xff]  ;;  %v1751_v1 = vld [vmem:[%s1717_s10 + $0x38] sm:$0xff]  ;;  %v1754_v2 = vld [vmem:[%s1717_s10 + $0x40] sm:$0xff] }
  0x87   : > { %s1085_s21 = sld [smem:[#allocation8 + $0x2]]  ;;  %s1739_s5 = sld [smem:[#allocation8 + $0x3]]  ;;  %v1757_v3 = vld [vmem:[%s1717_s10 + $0x48] sm:$0xff]  ;;  %v1764_v4 = vld [vmem:[%s1717_s10 + $0x50] sm:$0xff]  ;;  %v1767_v5 = vld [vmem:[%s1717_s10 + $0x58] sm:$0xff] }
  0x88   : > { %s1741_s29 = sld [smem:[#allocation8 + $0x4]]  ;;  %s1743_s11 = sld [smem:[#allocation8 + $0x5]]  ;;  %v1774_v7 = vld [vmem:[%s1717_s10 + $0x60] sm:$0xff]  ;;  %v1777_v8 = vld [vmem:[%s1717_s10 + $0x68] sm:$0xff]  ;;  %v1782_v13 = vld [vmem:[%s1717_s10 + $0x70] sm:$0xff] }
  0x89   : > { %s1748_s24 = sld [smem:[#allocation8 + $0x6]]  ;;  %s1759_s23 = sld [smem:[#allocation8 + $0x7]]  ;;  %v1785_v14 = vld [vmem:[%s1717_s10 + $0x78] sm:$0xff]  ;;  %v1796_v19 = vld [vmem:[%s1717_s10 + $0x80] sm:$0xff]  ;;  %v1799_v20 = vld [vmem:[%s1717_s10 + $0x88] sm:$0xff] }
  0x8a   : > { %s1761_s7 = sld [smem:[#allocation8 + $0x8]]  ;;  %s1769_s12 = sld [smem:[#allocation8 + $0x9]]  ;;  %v1804_v23 = vld [vmem:[%s1725_s6] sm:$0xff]  ;;  %v1807_v24 = vld [vmem:[%s1725_s6 + $0x8] sm:$0xff]  ;;  %v1816_v29 = vld [vmem:[%s1725_s6 + $0x10] sm:$0xff] }
  0x8b   : > { %s1771_s30 = sld [smem:[#allocation8 + $0xa]]  ;;  %s1791_s8 = sld [smem:[#allocation8 + $0xb]]  ;;  %v1819_v30 = vld [vmem:[%s1725_s6 + $0x18] sm:$0xff]  ;;  %v1826_v35 = vld [vmem:[%s1725_s6 + $0x20] sm:$0xff]  ;;  %v1829_v36 = vld [vmem:[%s1725_s6 + $0x28] sm:$0xff] }
  0x8c   : > { %v441_v6 = vstv %s308_s25  ;;  %v444_v11 = vstv %s1084_s26  ;;  %s1793_s9 = sld [smem:[#allocation8 + $0xc]]  ;;  %s1811_s14 = sld [smem:[#allocation8 + $0xd]]  ;;  %v1838_v41 = vld [vmem:[%s1725_s6 + $0x30] sm:$0xff]  ;;  %v1841_v42 = vld [vmem:[%s1725_s6 + $0x38] sm:$0xff] }
  0x8d   : > { %v442_v9 = vmul.f32 %v1746_v0, %v441_v6  ;;  %v443_v10 = vmul.f32 %v1751_v1, %v441_v6  ;;  %v449_v12 = vstv %s1085_s21  ;;  %v445_v15 = vmul.f32 %v1754_v2, %v444_v11  ;;  %s1813_s0 = sld [smem:[#allocation8 + $0xe]]  ;;  %s1833_s2 = sld [smem:[#allocation8 + $0xf]]  ;;  %v1848_v47 = vld [vmem:[%s1725_s6 + $0x40] sm:$0xff]  ;;  %v1851_v48 = vld [vmem:[%s1725_s6 + $0x48] sm:$0xff]  ;;  %v1856_v53 = vld [vmem:[%s1725_s6 + $0x50] sm:$0xff] }
  0x8e   : > { %v446_v16 = vmul.f32 %v1757_v3, %v444_v11  ;;  %v450_v17 = vmul.f32 %v1764_v4, %v449_v12  ;;  %v451_v18 = vmul.f32 %v1767_v5, %v449_v12  ;;  %v454_v21 = vstv %s1739_s5  ;;  %s1835_s25 = sld [smem:[#allocation8 + $0x10]]  ;;  %v1859_v54 = vld [vmem:[%s1725_s6 + $0x58] sm:$0xff]  ;;  %s1865_s26 = sld [smem:[#allocation8 + $0x11]] }
  0x8f   : > { %v459_v22 = vstv %s1741_s29  ;;  %v447_v25 = vadd.f32 %v445_v15, %v442_v9  ;;  %v455_v27 = vmul.f32 %v1774_v7, %v454_v21  ;;  %v456_v28 = vmul.f32 %v1777_v8, %v454_v21  ;;  %s1867_s21 = sld [smem:[#allocation8 + $0x12]]  ;;  %s1871_s6 = sld [smem:[#allocation8 + $0x13]] }
  0x90   : > { %v448_v26 = vadd.f32 %v446_v16, %v443_v10  ;;  %v460_v31 = vmul.f32 %v1782_v13, %v459_v22  ;;  %v461_v32 = vmul.f32 %v1785_v14, %v459_v22  ;;  %v464_v33 = vstv %s1743_s11  ;;  %s1873_s5 = sld [smem:[#allocation8 + $0x14]]  ;;  %s1891_s29 = sld [smem:[#allocation8 + $0x15]] }
  0x91   : > { %v469_v34 = vstv %s1748_s24  ;;  %v452_v37 = vadd.f32 %v450_v17, %v447_v25  ;;  %v465_v39 = vmul.f32 %v1796_v19, %v464_v33  ;;  %v466_v40 = vmul.f32 %v1799_v20, %v464_v33  ;;  %s1893_s11 = sld [smem:[#allocation8 + $0x16]]  ;;  %s1895_s24 = sld [smem:[#allocation8 + $0x17]] }
  0x92   : > { %v453_v38 = vadd.f32 %v451_v18, %v448_v26  ;;  %v470_v43 = vmul.f32 %v469_v34, %v1804_v23  ;;  %v471_v44 = vmul.f32 %v469_v34, %v1807_v24  ;;  %v474_v45 = vstv %s1759_s23  ;;  %s1897_s23 = sld [smem:[#allocation8 + $0x18]]  ;;  %p2368_p7 = scmp.ne.s32.totalorder %s2356_s27, 0 }
  0x93   : > { %v479_v46 = vstv %s1761_s7  ;;  %v457_v49 = vadd.f32 %v455_v27, %v452_v37  ;;  %v475_v51 = vmul.f32 %v1816_v29, %v474_v45  ;;  %v476_v52 = vmul.f32 %v1819_v30, %v474_v45  ;;  %s1907_s7 = sld [smem:[#allocation8 + $0x19]] }
  0x94   : > { %v458_v50 = vadd.f32 %v456_v28, %v453_v38  ;;  %v480_v55 = vmul.f32 %v1826_v35, %v479_v46  ;;  %v481_v56 = vmul.f32 %v1829_v36, %v479_v46  ;;  %v484_v57 = vstv %s1769_s12  ;;  %s1909_s12 = sld [smem:[#allocation8 + $0x1a]] }
  0x95   : > { %v489_v58 = vstv %s1771_s30  ;;  %v462_v59 = vadd.f32 %v460_v31, %v457_v49  ;;  %v485_v61 = vmul.f32 %v1838_v41, %v484_v57  ;;  %v486_v62 = vmul.f32 %v1841_v42, %v484_v57  ;;  %s1915_s30 = sld [smem:[#allocation8 + $0x1b]] }
  0x96   : > { %v463_v60 = vadd.f32 %v461_v32, %v458_v50  ;;  %v490_v63 = vmul.f32 %v1848_v47, %v489_v58  ;;  %v491_v6 = vmul.f32 %v1851_v48, %v489_v58  ;;  %v494_v9 = vstv %s1791_s8  ;;  %s1917_s8 = sld [smem:[#allocation8 + $0x1c]] }
  0x97   : > { %v501_v10 = vstv %s1793_s9  ;;  %v467_v11 = vadd.f32 %v465_v39, %v462_v59  ;;  %v495_v15 = vmul.f32 %v1856_v53, %v494_v9  ;;  %v496_v16 = vmul.f32 %v1859_v54, %v494_v9  ;;  %s1927_s9 = sld [smem:[#allocation8 + $0x1d]] }
  0x98   : > { %v468_v12 = vadd.f32 %v466_v40, %v463_v60  ;;  %v502_v17 = vmul.f32 %v1746_v0, %v501_v10  ;;  %v503_v18 = vmul.f32 %v1751_v1, %v501_v10  ;;  %v504_v21 = vstv %s1811_s14  ;;  %s1929_s14 = sld [smem:[#allocation8 + $0x1e]] }
  0x99   : > { %v509_v22 = vstv %s1813_s0  ;;  %v472_v25 = vadd.f32 %v470_v43, %v467_v11  ;;  %v505_v27 = vmul.f32 %v1754_v2, %v504_v21  ;;  %v506_v28 = vmul.f32 %v1757_v3, %v504_v21  ;;  %s1935_s0 = sld [smem:[#allocation8 + $0x1f]] }
  0x9a   : > { %v473_v26 = vadd.f32 %v471_v44, %v468_v12  ;;  %v510_v31 = vmul.f32 %v1764_v4, %v509_v22  ;;  %v511_v32 = vmul.f32 %v1767_v5, %v509_v22  ;;  %v514_v33 = vstv %s1833_s2  ;;  %s1937_s2 = sld [smem:[#allocation8 + $0x20]] }
  0x9b   : > { %v519_v34 = vstv %s1835_s25  ;;  %v477_v37 = vadd.f32 %v475_v51, %v472_v25  ;;  %v507_v39 = vadd.f32 %v505_v27, %v502_v17  ;;  %v508_v40 = vadd.f32 %v506_v28, %v503_v18  ;;  %s1955_s25 = sld [smem:[#allocation8 + $0x21]] }
  0x9c   : > { %v478_v38 = vadd.f32 %v476_v52, %v473_v26  ;;  %v515_v43 = vmul.f32 %v1774_v7, %v514_v33  ;;  %v516_v44 = vmul.f32 %v1777_v8, %v514_v33  ;;  %v520_v45 = vmul.f32 %v1782_v13, %v519_v34 }
  0x9d   : > { %v521_v46 = vmul.f32 %v1785_v14, %v519_v34  ;;  %v482_v49 = vadd.f32 %v480_v55, %v477_v37  ;;  %v512_v51 = vadd.f32 %v510_v31, %v507_v39  ;;  %v513_v57 = vadd.f32 %v511_v32, %v508_v40 }
  0x9e   : > { %v483_v50 = vadd.f32 %v481_v56, %v478_v38  ;;  %v524_v52 = vstv %s1865_s26  ;;  %v529_v58 = vstv %s1867_s21  ;;  %v534_v59 = vstv %s1871_s6  ;;  %s1957_s26 = sld [smem:[#allocation8 + $0x22]]  ;;  %s1963_s21 = sld [smem:[#allocation8 + $0x23]] }
  0x9f   : > { %v539_v60 = vstv %s1873_s5  ;;  %v487_v9 = vadd.f32 %v485_v61, %v482_v49  ;;  %v517_v11 = vadd.f32 %v515_v43, %v512_v51  ;;  %v518_v12 = vadd.f32 %v516_v44, %v513_v57  ;;  %s1965_s6 = sld [smem:[#allocation8 + $0x24]]  ;;  %s1971_s5 = sld [smem:[#allocation8 + $0x25]] }
  0xa0   : > { %v488_v10 = vadd.f32 %v486_v62, %v483_v50  ;;  %v525_v17 = vmul.f32 %v1796_v19, %v524_v52  ;;  %v526_v18 = vmul.f32 %v1799_v20, %v524_v52  ;;  %v530_v55 = vmul.f32 %v529_v58, %v1804_v23 }
  0xa1   : > { %v531_v56 = vmul.f32 %v529_v58, %v1807_v24  ;;  %v492_v21 = vadd.f32 %v490_v63, %v487_v9  ;;  %v522_v62 = vadd.f32 %v520_v45, %v517_v11  ;;  %v523_v22 = vadd.f32 %v521_v46, %v518_v12 }
  0xa2   : > { %v493_v61 = vadd.f32 %v491_v6, %v488_v10  ;;  %v535_v25 = vmul.f32 %v1816_v29, %v534_v59  ;;  %v536_v26 = vmul.f32 %v1819_v30, %v534_v59  ;;  %v540_v27 = vmul.f32 %v1826_v35, %v539_v60 }
  0xa3   : > { %v541_v28 = vmul.f32 %v1829_v36, %v539_v60  ;;  %v497_v31 = vadd.f32 %v495_v15, %v492_v21  ;;  %v527_v63 = vadd.f32 %v525_v17, %v522_v62  ;;  %v528_v33 = vadd.f32 %v526_v18, %v523_v22 }
  0xa4   : > { %v498_v32 = vadd.f32 %v496_v16, %v493_v61  ;;  %v544_v6 = vstv %s1891_s29  ;;  %v549_v34 = vstv %s1893_s11  ;;  %v554_v37 = vstv %s1895_s24  ;;  %s1973_s29 = sld [smem:[#allocation8 + $0x26]]  ;;  %s1979_s11 = sld [smem:[#allocation8 + $0x27]] }
  0xa5   : > { %v561_v38 = vstv %s1897_s23  ;;  %v1931_v39 = vmax.f32 %v497_v31, 0.0  ;;  %v532_v43 = vadd.f32 %v530_v55, %v527_v63  ;;  %v533_v44 = vadd.f32 %v531_v56, %v528_v33  ;;  %s1981_s24 = sld [smem:[#allocation8 + $0x28]]  ;;  %s1993_s23 = sld [smem:[#allocation8 + $0x29]] }
  0xa6   : > { %v1933_v40 = vmax.f32 %v498_v32, 0.0  ;;  %v545_v15 = vmul.f32 %v1838_v41, %v544_v6  ;;  %v546_v16 = vmul.f32 %v1841_v42, %v544_v6  ;;  %v550_v45 = vmul.f32 %v1848_v47, %v549_v34 }
  0xa7   : > { %v551_v46 = vmul.f32 %v1851_v48, %v549_v34  ;;  %v537_v49 = vadd.f32 %v535_v25, %v532_v43  ;;  %v538_v50 = vadd.f32 %v536_v26, %v533_v44  ;;  %v555_v51 = vmul.f32 %v1856_v53, %v554_v37 }
  0xa8   : > { %v556_v57 = vmul.f32 %v1859_v54, %v554_v37  ;;  %v562_v52 = vmul.f32 %v1746_v0, %v561_v38  ;;  %v563_v58 = vmul.f32 %v1751_v1, %v561_v38  ;;  %v564_v59 = vstv %s1907_s7  ;;  %s1995_s7 = sld [smem:[#allocation8 + $0x2a]] }
  0xa9   : > { %v569_v60 = vstv %s1909_s12  ;;  %v542_v9 = vadd.f32 %v540_v27, %v537_v49  ;;  %v543_v10 = vadd.f32 %v541_v28, %v538_v50  ;;  %v565_v11 = vmul.f32 %v1754_v2, %v564_v59  ;;  %s2007_s12 = sld [smem:[#allocation8 + $0x2b]] }
  0xaa   : > { %v566_v12 = vmul.f32 %v1757_v3, %v564_v59  ;;  %v570_v17 = vmul.f32 %v1764_v4, %v569_v60  ;;  %v571_v18 = vmul.f32 %v1767_v5, %v569_v60  ;;  %v574_v55 = vstv %s1915_s30  ;;  %s2009_s30 = sld [smem:[#allocation8 + $0x2c]] }
  0xab   : > { %v579_v56 = vstv %s1917_s8  ;;  %v547_v21 = vadd.f32 %v545_v15, %v542_v9  ;;  %v548_v61 = vadd.f32 %v546_v16, %v543_v10  ;;  %v567_v62 = vadd.f32 %v565_v11, %v562_v52  ;;  %s2019_s8 = sld [smem:[#allocation8 + $0x2d]] }
  0xac   : > { %v568_v22 = vadd.f32 %v566_v12, %v563_v58  ;;  %v575_v25 = vmul.f32 %v1774_v7, %v574_v55  ;;  %v576_v26 = vmul.f32 %v1777_v8, %v574_v55  ;;  %v580_v27 = vmul.f32 %v1782_v13, %v579_v56 }
  0xad   : > { %v581_v28 = vmul.f32 %v1785_v14, %v579_v56  ;;  %v552_v31 = vadd.f32 %v550_v45, %v547_v21  ;;  %v553_v32 = vadd.f32 %v551_v46, %v548_v61  ;;  %v572_v63 = vadd.f32 %v570_v17, %v567_v62 }
  0xae   : > { %v573_v33 = vadd.f32 %v571_v18, %v568_v22  ;;  %v584_v6 = vstv %s1927_s9  ;;  %v589_v34 = vstv %s1929_s14  ;;  %v594_v37 = vstv %s1935_s0  ;;  %s2021_s9 = sld [smem:[#allocation8 + $0x2e]]  ;;  %s2027_s14 = sld [smem:[#allocation8 + $0x2f]] }
  0xaf   : > { %v599_v38 = vstv %s1937_s2  ;;  %v557_v43 = vadd.f32 %v555_v51, %v552_v31  ;;  %v558_v44 = vadd.f32 %v556_v57, %v553_v32  ;;  %v577_v15 = vadd.f32 %v575_v25, %v572_v63  ;;  %s2029_s0 = sld [smem:[#allocation8 + $0x30]]  ;;  %s2035_s2 = sld [smem:[#allocation8 + $0x31]] }
  0xb0   : > { %v578_v16 = vadd.f32 %v576_v26, %v573_v33  ;;  %v585_v49 = vmul.f32 %v1796_v19, %v584_v6  ;;  %v586_v45 = vmul.f32 %v1799_v20, %v584_v6  ;;  %v590_v46 = vmul.f32 %v589_v34, %v1804_v23 }
  0xb1   : > { %v591_v50 = vmul.f32 %v589_v34, %v1807_v24  ;;  %v1983_v52 = vmax.f32 %v557_v43, 0.0  ;;  %v1985_v51 = vmax.f32 %v558_v44, 0.0  ;;  %v582_v57 = vadd.f32 %v580_v27, %v577_v15 }
  0xb2   : > { %v583_v58 = vadd.f32 %v581_v28, %v578_v16  ;;  %v595_v59 = vmul.f32 %v1816_v29, %v594_v37  ;;  %v596_v60 = vmul.f32 %v1819_v30, %v594_v37  ;;  %v600_v9 = vmul.f32 %v1826_v35, %v599_v38 }
  0xb3   : > { %v601_v10 = vmul.f32 %v1829_v36, %v599_v38  ;;  %v587_v11 = vadd.f32 %v585_v49, %v582_v57  ;;  %v604_v17 = vstv %s1955_s25  ;;  %v609_v18 = vstv %s1957_s26  ;;  %s2037_s25 = sld [smem:[#allocation8 + $0x32]]  ;;  %s2043_s26 = sld [smem:[#allocation8 + $0x33]] }
  0xb4   : > { %v588_v12 = vadd.f32 %v586_v45, %v583_v58  ;;  %v605_v55 = vmul.f32 %v1838_v41, %v604_v17  ;;  %v606_v56 = vmul.f32 %v1841_v42, %v604_v17  ;;  %v610_v21 = vmul.f32 %v1848_v47, %v609_v18 }
  0xb5   : > { %v611_v61 = vmul.f32 %v1851_v48, %v609_v18  ;;  %v592_v62 = vadd.f32 %v590_v46, %v587_v11  ;;  %v614_v25 = vstv %s1963_s21  ;;  %v621_v26 = vstv %s1965_s6  ;;  %s2045_s21 = sld [smem:[#allocation8 + $0x34]]  ;;  %s2057_s6 = sld [smem:[#allocation8 + $0x35]] }
  0xb6   : > { %v593_v22 = vadd.f32 %v591_v50, %v588_v12  ;;  %v615_v27 = vmul.f32 %v1856_v53, %v614_v25  ;;  %v616_v28 = vmul.f32 %v1859_v54, %v614_v25  ;;  %v622_v31 = vmul.f32 %v1746_v0, %v621_v26 }
  0xb7   : > { %v623_v32 = vmul.f32 %v1751_v1, %v621_v26  ;;  %v597_v63 = vadd.f32 %v595_v59, %v592_v62  ;;  %v624_v6 = vstv %s1971_s5  ;;  %v629_v34 = vstv %s1973_s29  ;;  %s2059_s5 = sld [smem:[#allocation8 + $0x36]]  ;;  %s2071_s29 = sld [smem:[#allocation8 + $0x37]] }
  0xb8   : > { %v598_v33 = vadd.f32 %v596_v60, %v593_v22  ;;  %v625_v37 = vmul.f32 %v1754_v2, %v624_v6  ;;  %v626_v38 = vmul.f32 %v1757_v3, %v624_v6  ;;  %v630_v43 = vmul.f32 %v1764_v4, %v629_v34 }
  0xb9   : > { %v631_v44 = vmul.f32 %v1767_v5, %v629_v34  ;;  %v602_v15 = vadd.f32 %v600_v9, %v597_v63  ;;  %v634_v49 = vstv %s1979_s11  ;;  %v639_v45 = vstv %s1981_s24  ;;  %s2073_s11 = sld [smem:[#allocation8 + $0x38]]  ;;  %s2083_s24 = sld [smem:[#allocation8 + $0x39]] }
  0xba   : > { %v603_v16 = vadd.f32 %v601_v10, %v598_v33  ;;  %v627_v46 = vadd.f32 %v625_v37, %v622_v31  ;;  %v628_v50 = vadd.f32 %v626_v38, %v623_v32  ;;  %v635_v57 = vmul.f32 %v1774_v7, %v634_v49 }
  0xbb   : > { %v636_v58 = vmul.f32 %v1777_v8, %v634_v49  ;;  %v607_v59 = vadd.f32 %v605_v55, %v602_v15  ;;  %v640_v11 = vmul.f32 %v1782_v13, %v639_v45  ;;  %v641_v9 = vmul.f32 %v1785_v14, %v639_v45 }
  0xbc   : > { %v608_v60 = vadd.f32 %v606_v56, %v603_v16  ;;  %v632_v10 = vadd.f32 %v630_v43, %v627_v46  ;;  %v633_v12 = vadd.f32 %v631_v44, %v628_v50  ;;  %v644_v17 = vstv %s1993_s23  ;;  %s2085_s23 = sld [smem:[#allocation8 + $0x3a]] }
  0xbd   : > { %v649_v18 = vstv %s1995_s7  ;;  %v612_v62 = vadd.f32 %v610_v21, %v607_v59  ;;  %v645_v25 = vmul.f32 %v1796_v19, %v644_v17  ;;  %v646_v55 = vmul.f32 %v1799_v20, %v644_v17  ;;  %s2091_s7 = sld [smem:[#allocation8 + $0x3b]] }
  0xbe   : > { %v613_v22 = vadd.f32 %v611_v61, %v608_v60  ;;  %v637_v56 = vadd.f32 %v635_v57, %v632_v10  ;;  %v638_v26 = vadd.f32 %v636_v58, %v633_v12  ;;  %v650_v31 = vmul.f32 %v649_v18, %v1804_v23 }
  0xbf   : > { %v651_v32 = vmul.f32 %v649_v18, %v1807_v24  ;;  %v617_v63 = vadd.f32 %v615_v27, %v612_v62  ;;  %v654_v21 = vstv %s2007_s12  ;;  %v659_v61 = vstv %s2009_s30  ;;  %s2093_s12 = sld [smem:[#allocation8 + $0x3c]]  ;;  %s2099_s30 = sld [smem:[#allocation8 + $0x3d]] }
  0xc0   : > { %v618_v33 = vadd.f32 %v616_v28, %v613_v22  ;;  %v642_v6 = vadd.f32 %v640_v11, %v637_v56  ;;  %v643_v34 = vadd.f32 %v641_v9, %v638_v26  ;;  %v655_v37 = vmul.f32 %v1816_v29, %v654_v21 }
  0xc1   : > { %v656_v38 = vmul.f32 %v1819_v30, %v654_v21  ;;  %v2049_v43 = vmax.f32 %v617_v63, 0.0  ;;  %v660_v27 = vmul.f32 %v1826_v35, %v659_v61  ;;  %v661_v28 = vmul.f32 %v1829_v36, %v659_v61 }
  0xc2   : > { %v2051_v44 = vmax.f32 %v618_v33, 0.0  ;;  %v647_v15 = vadd.f32 %v645_v25, %v642_v6  ;;  %v648_v16 = vadd.f32 %v646_v55, %v643_v34  ;;  %v664_v49 = vstv %s2019_s8  ;;  %s2101_s8 = sld [smem:[#allocation8 + $0x3e]] }
  0xc3   : > { %v669_v45 = vstv %s2021_s9  ;;  %v665_v46 = vmul.f32 %v1838_v41, %v664_v49  ;;  %v666_v50 = vmul.f32 %v1841_v42, %v664_v49  ;;  %v674_v11 = vstv %s2027_s14  ;;  %s2107_s9 = sld [smem:[#allocation8 + $0x3f]]  ;;  %s2109_s14 = sld [smem:[#allocation8 + $0x40]] }
  0xc4   : > { %v670_v57 = vmul.f32 %v1848_v47, %v669_v45  ;;  %v671_v58 = vmul.f32 %v1851_v48, %v669_v45  ;;  %v652_v59 = vadd.f32 %v650_v31, %v647_v15  ;;  %v653_v60 = vadd.f32 %v651_v32, %v648_v16 }
  0xc5   : > { %v681_v9 = vstv %s2029_s0  ;;  %v675_v10 = vmul.f32 %v1856_v53, %v674_v11  ;;  %v676_v12 = vmul.f32 %v1859_v54, %v674_v11  ;;  %v684_v25 = vstv %s2035_s2  ;;  %s2121_s0 = sld [smem:[#allocation8 + $0x41]]  ;;  %s2123_s2 = sld [smem:[#allocation8 + $0x42]] }
  0xc6   : > { %v682_v17 = vmul.f32 %v1746_v0, %v681_v9  ;;  %v683_v18 = vmul.f32 %v1751_v1, %v681_v9  ;;  %v657_v62 = vadd.f32 %v655_v37, %v652_v59  ;;  %v658_v22 = vadd.f32 %v656_v38, %v653_v60 }
  0xc7   : > { %v689_v55 = vstv %s2037_s25  ;;  %v685_v56 = vmul.f32 %v1754_v2, %v684_v25  ;;  %v686_v26 = vmul.f32 %v1757_v3, %v684_v25  ;;  %v694_v21 = vstv %s2043_s26  ;;  %s2135_s25 = sld [smem:[#allocation8 + $0x43]]  ;;  %s2137_s26 = sld [smem:[#allocation8 + $0x44]] }
  0xc8   : > { %v690_v31 = vmul.f32 %v1764_v4, %v689_v55  ;;  %v691_v32 = vmul.f32 %v1767_v5, %v689_v55  ;;  %v662_v63 = vadd.f32 %v660_v27, %v657_v62  ;;  %v663_v33 = vadd.f32 %v661_v28, %v658_v22 }
  0xc9   : > { %v699_v61 = vstv %s2045_s21  ;;  %v687_v6 = vadd.f32 %v685_v56, %v682_v17  ;;  %v688_v34 = vadd.f32 %v686_v26, %v683_v18  ;;  %v695_v37 = vmul.f32 %v1774_v7, %v694_v21  ;;  %s2147_s21 = sld [smem:[#allocation8 + $0x45]] }
  0xca   : > { %v696_v38 = vmul.f32 %v1777_v8, %v694_v21  ;;  %v667_v15 = vadd.f32 %v665_v46, %v662_v63  ;;  %v668_v16 = vadd.f32 %v666_v50, %v663_v33  ;;  %v700_v49 = vmul.f32 %v1782_v13, %v699_v61 }
  0xcb   : > { %v701_v27 = vmul.f32 %v1785_v14, %v699_v61  ;;  %v692_v28 = vadd.f32 %v690_v31, %v687_v6  ;;  %v693_v45 = vadd.f32 %v691_v32, %v688_v34  ;;  %v704_v59 = vstv %s2057_s6  ;;  %s2149_s6 = sld [smem:[#allocation8 + $0x46]] }
  0xcc   : > { %v709_v60 = vstv %s2059_s5  ;;  %v672_v11 = vadd.f32 %v670_v57, %v667_v15  ;;  %v673_v9 = vadd.f32 %v671_v58, %v668_v16  ;;  %v705_v17 = vmul.f32 %v1796_v19, %v704_v59  ;;  %s2155_s5 = sld [smem:[#allocation8 + $0x47]] }
  0xcd   : > { %v706_v46 = vmul.f32 %v1799_v20, %v704_v59  ;;  %v697_v50 = vadd.f32 %v695_v37, %v692_v28  ;;  %v698_v18 = vadd.f32 %v696_v38, %v693_v45  ;;  %v710_v62 = vmul.f32 %v709_v60, %v1804_v23 }
  0xce   : > { %v711_v22 = vmul.f32 %v709_v60, %v1807_v24  ;;  %v677_v25 = vadd.f32 %v675_v10, %v672_v11  ;;  %v678_v55 = vadd.f32 %v676_v12, %v673_v9  ;;  %v714_v57 = vstv %s2071_s29  ;;  %s2157_s29 = sld [smem:[#allocation9]] }
  0xcf   : > { %v719_v58 = vstv %s2073_s11  ;;  %v702_v56 = vadd.f32 %v700_v49, %v697_v50  ;;  %v703_v26 = vadd.f32 %v701_v27, %v698_v18  ;;  %v715_v31 = vmul.f32 %v1816_v29, %v714_v57  ;;  %s2163_s11 = sld [smem:[#allocation9 + $0x1]] }
  0xd0   : > { %v716_v32 = vmul.f32 %v1819_v30, %v714_v57  ;;  %v2113_v63 = vmax.f32 %v677_v25, 0.0  ;;  %v2115_v33 = vmax.f32 %v678_v55, 0.0  ;;  %v720_v10 = vmul.f32 %v1826_v35, %v719_v58 }
  0xd1   : > { %v721_v12 = vmul.f32 %v1829_v36, %v719_v58  ;;  %v707_v21 = vadd.f32 %v705_v17, %v702_v56  ;;  %v708_v61 = vadd.f32 %v706_v46, %v703_v26  ;;  %v724_v6 = vstv %s2083_s24  ;;  %s2165_s24 = sld [smem:[#allocation9 + $0x2]] }
  0xd2   : > { %v729_v34 = vstv %s2085_s23  ;;  %v725_v37 = vmul.f32 %v1838_v41, %v724_v6  ;;  %v726_v38 = vmul.f32 %v1841_v42, %v724_v6  ;;  %v734_v28 = vstv %s2091_s7  ;;  %s2171_s23 = sld [smem:[#allocation9 + $0x3]]  ;;  %s2173_s7 = sld [smem:[#allocation9 + $0x4]] }
  0xd3   : > { %v730_v15 = vmul.f32 %v1848_v47, %v729_v34  ;;  %v731_v16 = vmul.f32 %v1851_v48, %v729_v34  ;;  %v712_v49 = vadd.f32 %v710_v62, %v707_v21  ;;  %v713_v27 = vadd.f32 %v711_v22, %v708_v61 }
  0xd4   : > { %v741_v45 = vstv %s2093_s12  ;;  %v735_v59 = vmul.f32 %v1856_v53, %v734_v28  ;;  %v736_v60 = vmul.f32 %v1859_v54, %v734_v28  ;;  %v744_v50 = vstv %s2099_s30  ;;  %s2185_s12 = sld [smem:[#allocation9 + $0x5]]  ;;  %s2187_s30 = sld [smem:[#allocation9 + $0x6]] }
  0xd5   : > { %v742_v11 = vmul.f32 %v1746_v0, %v741_v45  ;;  %v743_v9 = vmul.f32 %v1751_v1, %v741_v45  ;;  %v717_v17 = vadd.f32 %v715_v31, %v712_v49  ;;  %v718_v46 = vadd.f32 %v716_v32, %v713_v27 }
  0xd6   : > { %v749_v18 = vstv %s2101_s8  ;;  %v745_v62 = vmul.f32 %v1754_v2, %v744_v50  ;;  %v746_v22 = vmul.f32 %v1757_v3, %v744_v50  ;;  %v754_v58 = vstv %s2107_s9  ;;  %s2195_s8 = sld [smem:[#allocation9 + $0x7]]  ;;  %s2197_s9 = sld [smem:[#allocation9 + $0x8]] }
  0xd7   : > { %v750_v25 = vmul.f32 %v1764_v4, %v749_v18  ;;  %v751_v55 = vmul.f32 %v1767_v5, %v749_v18  ;;  %v722_v57 = vadd.f32 %v720_v10, %v717_v17  ;;  %v723_v0 = vadd.f32 %v721_v12, %v718_v46 }
  0xd8   : > { %v759_v1 = vstv %s2109_s14  ;;  %v747_v56 = vadd.f32 %v745_v62, %v742_v11  ;;  %v748_v26 = vadd.f32 %v746_v22, %v743_v9  ;;  %v755_v2 = vmul.f32 %v1774_v7, %v754_v58  ;;  %s2209_s14 = sld [smem:[#allocation9 + $0x9]] }
  0xd9   : > { %v756_v3 = vmul.f32 %v1777_v8, %v754_v58  ;;  %v727_v31 = vadd.f32 %v725_v37, %v722_v57  ;;  %v728_v4 = vadd.f32 %v726_v38, %v723_v0  ;;  %v760_v5 = vmul.f32 %v1782_v13, %v759_v1 }
  0xda   : > { %v761_v32 = vmul.f32 %v1785_v14, %v759_v1  ;;  %v752_v10 = vadd.f32 %v750_v25, %v747_v56  ;;  %v753_v12 = vadd.f32 %v751_v55, %v748_v26  ;;  %v764_v21 = vstv %s2121_s0  ;;  %s2211_s0 = sld [smem:[#allocation9 + $0xa]] }
  0xdb   : > { %v769_v61 = vstv %s2123_s2  ;;  %v732_v6 = vadd.f32 %v730_v15, %v727_v31  ;;  %v733_v7 = vadd.f32 %v731_v16, %v728_v4  ;;  %v765_v8 = vmul.f32 %v1796_v19, %v764_v21  ;;  %s2215_s2 = sld [smem:[#allocation9 + $0xb]] }
  0xdc   : > { %v766_v34 = vmul.f32 %v1799_v20, %v764_v21  ;;  %v757_v13 = vadd.f32 %v755_v2, %v752_v10  ;;  %v758_v14 = vadd.f32 %v756_v3, %v753_v12  ;;  %v770_v37 = vmul.f32 %v769_v61, %v1804_v23 }
  0xdd   : > { %v771_v38 = vmul.f32 %v769_v61, %v1807_v24  ;;  %v737_v49 = vadd.f32 %v735_v59, %v732_v6  ;;  %v738_v27 = vadd.f32 %v736_v60, %v733_v7  ;;  %v774_v15 = vstv %s2135_s25  ;;  %s2217_s25 = sld [smem:[#allocation9 + $0xc]] }
  0xde   : > { %v779_v16 = vstv %s2137_s26  ;;  %v762_v19 = vadd.f32 %v760_v5, %v757_v13  ;;  %v763_v20 = vadd.f32 %v761_v32, %v758_v14  ;;  %v775_v28 = vmul.f32 %v1816_v29, %v774_v15  ;;  %s2229_s26 = sld [smem:[#allocation9 + $0xd]] }
  0xdf   : > { %v776_v45 = vmul.f32 %v1819_v30, %v774_v15  ;;  %v2177_v11 = vmax.f32 %v737_v49, 0.0  ;;  %v2179_v23 = vmax.f32 %v738_v27, 0.0  ;;  %v780_v24 = vmul.f32 %v1826_v35, %v779_v16 }
  0xe0   : > { %v781_v59 = vmul.f32 %v1829_v36, %v779_v16  ;;  %v767_v60 = vadd.f32 %v765_v8, %v762_v19  ;;  %v768_v9 = vadd.f32 %v766_v34, %v763_v20  ;;  %v784_v17 = vstv %s2147_s21  ;;  %s2231_s21 = sld [smem:[#allocation9 + $0xe]] }
  0xe1   : > { %v789_v46 = vstv %s2149_s6  ;;  %v785_v29 = vmul.f32 %v1838_v41, %v784_v17  ;;  %v786_v30 = vmul.f32 %v1841_v42, %v784_v17  ;;  %v794_v62 = vstv %s2155_s5  ;;  %s2237_s6 = sld [smem:[#allocation9 + $0xf]]  ;;  %s2239_s5 = sld [smem:[#allocation9 + $0x10]] }
  0xe2   : > { %v790_v50 = vmul.f32 %v1848_v47, %v789_v46  ;;  %v791_v35 = vmul.f32 %v1851_v48, %v789_v46  ;;  %v772_v18 = vadd.f32 %v770_v37, %v767_v60  ;;  %v773_v36 = vadd.f32 %v771_v38, %v768_v9 }
  0xe3   : > { %v801_v22 = vstv %s2157_s29  ;;  %v795_v25 = vmul.f32 %v1856_v53, %v794_v62  ;;  %v796_v41 = vmul.f32 %v1859_v54, %v794_v62  ;;  %v804_v57 = vstv %s2163_s11  ;;  %s1211_s29 = smul.u32 48, %s1713_s3  ;;  %s2252_s11 = sld [smem:[#allocation9 + $0x11]] }
  0xe4   : > { %v802_v42 = vmul.f32 %v801_v22, %v1931_v39  ;;  %v803_v47 = vmul.f32 %v801_v22, %v1933_v40  ;;  %v777_v55 = vadd.f32 %v775_v28, %v772_v18  ;;  %v778_v48 = vadd.f32 %v776_v45, %v773_v36 }
  0xe5   : > { %v809_v0 = vstv %s2165_s24  ;;  %v805_v58 = vmul.f32 %v804_v57, %v1983_v52  ;;  %v806_v1 = vmul.f32 %v804_v57, %v1985_v51  ;;  %v814_v2 = vstv %s2171_s23  ;;  %s2262_s24 = scalar_lea.vmem [#allocation11], %s1211_s29  ;;  %s1212_s23 = smul.u32 768, %s1481_s18 }
  0xe6   : > { %v810_v56 = vmul.f32 %v809_v0, %v2049_v43  ;;  %v811_v53 = vmul.f32 %v809_v0, %v2051_v44  ;;  %v782_v54 = vadd.f32 %v780_v24, %v777_v55  ;;  %v783_v26 = vadd.f32 %v781_v59, %v778_v48  ;;  %s908_s18 = scalar_lea.sflag [#allocation4], %s1713_s3 }
  0xe7   : > { %v819_v3 = vstv %s2173_s7  ;;  %v807_v31 = vadd.f32 %v805_v58, %v802_v42  ;;  %v808_v4 = vadd.f32 %v806_v1, %v803_v47  ;;  %v815_v5 = vmul.f32 %v814_v2, %v2113_v63  ;;  %v829_v42 = vld [vmem:[%s1717_s10] sm:$0xff]  ;;  %v830_v47 = vld [vmem:[%s1717_s10 + $0x8] sm:$0xff]  ;;  %s923_s7 = sshll.u32 %s2262_s24, 4  ;;  %s2288_s7 = int_to_ptr.vmem [resolvable:$true] %s923_s7 }
  0xe8   : > { %v816_v32 = vmul.f32 %v814_v2, %v2115_v33  ;;  %v787_v10 = vadd.f32 %v785_v29, %v782_v54  ;;  %v788_v12 = vadd.f32 %v786_v30, %v783_v26  ;;  %v820_v21 = vmul.f32 %v819_v3, %v2177_v11 }
  0xe9   : > { %v821_v61 = vmul.f32 %v819_v3, %v2179_v23  ;;  %v812_v6 = vadd.f32 %v810_v56, %v807_v31  ;;  %v813_v7 = vadd.f32 %v811_v53, %v808_v4  ;;  %v824_v8 = vstv %s2185_s12 }
  0xea   : > { %v835_v34 = vstv %s2187_s30  ;;  %v792_v13 = vadd.f32 %v790_v50, %v787_v10  ;;  %v793_v14 = vadd.f32 %v791_v35, %v788_v12  ;;  %v838_v15 = vstv %s2195_s8  ;;  %s2286_s8 = scalar_lea.hbm %s2343_s4, %s1212_s23 }
  0xeb   : > { %v836_v37 = vmul.f32 %v835_v34, %v1931_v39  ;;  %v837_v38 = vmul.f32 %v835_v34, %v1933_v40  ;;  %v817_v49 = vadd.f32 %v815_v5, %v812_v6  ;;  %v818_v27 = vadd.f32 %v816_v32, %v813_v7 }
  0xec   : > { %v843_v16 = vstv %s2197_s9  ;;  %v797_v19 = vadd.f32 %v795_v25, %v792_v13  ;;  %v798_v20 = vadd.f32 %v796_v41, %v793_v14  ;;  %v839_v28 = vmul.f32 %v838_v15, %v1983_v52  ;;  %s1395_s9 = scalar_lea.vmem %s2288_s7, 768 }
  0xed   : > { %v840_v45 = vmul.f32 %v838_v15, %v1985_v51  ;;  %v822_v24 = vadd.f32 %v820_v21, %v817_v49  ;;  %v823_v59 = vadd.f32 %v821_v61, %v818_v27  ;;  %v844_v60 = vmul.f32 %v843_v16, %v2049_v43  ;;  %p1396_p11 = scmp.ne.s32.totalorder %s2288_s7, %s1395_s9 }
  0xee   : > { %v845_v9 = vmul.f32 %v843_v16, %v2051_v44  ;;  %v799_v17 = vmax.f32 %v797_v19, 0.0  ;;  %v800_v46 = vmax.f32 %v798_v20, 0.0  ;;  %v841_v29 = vadd.f32 %v839_v28, %v836_v37 }
  0xef   : > { %v842_v30 = vadd.f32 %v840_v45, %v837_v38  ;;  %v848_v50 = vstv %s2209_s14  ;;  %v853_v35 = vstv %s2211_s0  ;;  %v858_v18 = vstv %s2215_s2  ;;  %v1198_v45 = vld [vmem:[%s1717_s10 + $0x20] sm:$0xff]  ;;  %p1397_p3 = pnand %p1396_p11, %p2368_p7 }
  0xf0   : > { %v871_v36 = vstv %s2217_s25  ;;  %v825_v62 = vmul.f32 %v824_v8, %v799_v17  ;;  %v826_v22 = vmul.f32 %v824_v8, %v800_v46  ;;  %v846_v25 = vadd.f32 %v844_v60, %v841_v29 }
  0xf1   : > { %v847_v41 = vadd.f32 %v845_v9, %v842_v30  ;;  %v849_v55 = vmul.f32 %v848_v50, %v2113_v63  ;;  %v850_v48 = vmul.f32 %v848_v50, %v2115_v33  ;;  %v854_v57 = vmul.f32 %v853_v35, %v2177_v11  ;;  %p1398_p8 = pneg %p1397_p3 }
  0xf2   : > { %v855_v0 = vmul.f32 %v853_v35, %v2179_v23  ;;  %v827_v58 = vadd.f32 %v825_v62, %v822_v24  ;;  %v828_v1 = vadd.f32 %v826_v22, %v823_v59  ;;  %v859_v56 = vmul.f32 %v858_v18, %v799_v17  ;;  %v1199_v24 = vld [vmem:[%s1717_s10 + $0x28] sm:$0xff] }
  0xf3   : > { %v860_v53 = vmul.f32 %v858_v18, %v800_v46  ;;  %v851_v54 = vadd.f32 %v849_v55, %v846_v25  ;;  %v852_v26 = vadd.f32 %v850_v48, %v847_v41  ;;  %v872_v2 = vmul.f32 %v871_v36, %v1931_v39  ;;  %v1194_v39 = vld [vmem:[%s1717_s10 + $0x10] sm:$0xff] }
  0xf4   : > { %v873_v3 = vmul.f32 %v871_v36, %v1933_v40  ;;  %v831_v31 = vadd.f32 %v829_v42, %v827_v58  ;;  %v832_v4 = vadd.f32 %v830_v47, %v828_v1  ;;  %v874_v5 = vstv %s2229_s26  ;;  %v1195_v40 = vld [vmem:[%s1717_s10 + $0x18] sm:$0xff]  ;;  %s1497_s10 = smov [#allocation11]  }
  0xf5   : > { %v879_v32 = vstv %s2231_s21  ;;  %v856_v10 = vadd.f32 %v854_v57, %v851_v54  ;;  %v857_v12 = vadd.f32 %v855_v0, %v852_v26  ;;  %v875_v21 = vmul.f32 %v874_v5, %v1983_v52  ;;  %s1399_s14 = sshll.u32 %s1497_s10, 4  ;;  %s1400_s14 = int_to_ptr.vmem [resolvable:$false] %s1399_s14 }
  0xf6   : > { %v876_v61 = vmul.f32 %v874_v5, %v1985_v51  ;;  %833 = vst [vmem:[%s2262_s24] sm:$0xff] %v831_v31  ;;  %834 = vst [vmem:[%s2262_s24 + $0x8] sm:$0xff] %v832_v4  ;;  %v880_v6 = vmul.f32 %v879_v32, %v2049_v43  ;;  %v881_v7 = vmul.f32 %v879_v32, %v2051_v44  ;;  %v884_v8 = vstv %s2237_s6  ;;  %s1401_s0 = scalar_lea.vmem %s1400_s14, 1536  ;;  %p1402_p13 = scmp.lt.s32.totalorder %s2288_s7, %s1400_s14 }
  0xf7   : > { %v889_v52 = vstv %s2239_s5  ;;  %v861_v34 = vadd.f32 %v859_v56, %v856_v10  ;;  %v862_v51 = vadd.f32 %v860_v53, %v857_v12  ;;  %v877_v13 = vadd.f32 %v875_v21, %v872_v2  ;;  %p1403_p4 = scmp.lt.s32.totalorder %s1401_s0, %s1395_s9 }
  0xf8   : > { %v878_v14 = vadd.f32 %v876_v61, %v873_v3  ;;  %v885_v37 = vmul.f32 %v884_v8, %v2113_v63  ;;  %v886_v38 = vmul.f32 %v884_v8, %v2115_v33  ;;  %v890_v49 = vmul.f32 %v889_v52, %v2177_v11 }
  0xf9   : > { %v891_v43 = vmul.f32 %v889_v52, %v2179_v23  ;;  %v866_v44 = vadd.f32 %v1194_v39, %v861_v34  ;;  %v867_v27 = vadd.f32 %v1195_v40, %v862_v51  ;;  %v882_v15 = vadd.f32 %v880_v6, %v877_v13  ;;  %p1404_p10 = por %p1403_p4, %p1402_p13 }
  0xfa   : > { %v883_v16 = vadd.f32 %v881_v7, %v878_v14  ;;  %v894_v19 = vstv %s2252_s11 }
  0xfb   : > { %1196 = vst [vmem:[%s2262_s24 + $0x10] sm:$0xff] %v866_v44  ;;  %1197 = vst [vmem:[%s2262_s24 + $0x18] sm:$0xff] %v867_v27  ;;  %v887_v20 = vadd.f32 %v885_v37, %v882_v15  ;;  %v895_v63 = vmul.f32 %v894_v19, %v799_v17  ;;  %v896_v33 = vmul.f32 %v894_v19, %v800_v46  ;;  %p1405_p2 = pnand %p1404_p10, %p1398_p8 }
  0xfc   : > { %v888_v28 = vadd.f32 %v886_v38, %v883_v16 }
  0xfd   : > { %v892_v11 = vadd.f32 %v890_v49, %v887_v20 }
  0xfe   : > { %v893_v23 = vadd.f32 %v891_v43, %v888_v28 }
  0xff   : > { %v897_v59 = vadd.f32 %v895_v63, %v892_v11 }
 0x100   : > { %v898_v60 = vadd.f32 %v896_v33, %v893_v23 }
 0x101   : > { %v902_v9 = vadd.f32 %v1198_v45, %v897_v59 }
 0x102   : > { %v903_v29 = vadd.f32 %v1199_v24, %v898_v60 }
 0x103   : > { %1200 = vst [vmem:[%s2262_s24 + $0x20] sm:$0xff] %v902_v9 }
 0x104   : > { %1201 = vst [vmem:[%s2262_s24 + $0x28] sm:$0xff] %v903_v29 }
 0x105   : > { %1408 = shalt.err (!%p1405_p2)
}
 0x106   : > { %s1409_s2 = scalar_lea.hbm %s2286_s8, 768  ;;  %s1413_s21 = scalar_lea.hbm %s2343_s4, 1536 }
 0x107   : > { %p1410_p5 = scmp.ne.s32.totalorder %s2286_s8, %s1409_s2  ;;  %p1414_p12 = scmp.lt.u32.totalorder %s2286_s8, %s2343_s4 }
 0x108   : > { %p1415_p0 = scmp.lt.u32.totalorder %s1413_s21, %s1409_s2  ;;  %p1417_p11 = scmp.lt.u32.totalorder %s1409_s2, %s2286_s8 }
 0x109   : > { %p1411_p1 = pnand %p1410_p5, %p2368_p7 }
 0x10a   : > { %p1416_p9 = por %p1415_p0, %p1414_p12 }
 0x10b   : > { %p1412_p6 = pneg %p1411_p1 }
 0x10c   : > { %p1418_p3 = por %p1417_p11, %p1416_p9 }
 0x10e   : > { %p1419_p8 = pnand %p1418_p3, %p1412_p6 }
 0x110   : > { %1422 = shalt.err (!%p1419_p8)
}
 0x111   : > { %s1498_s29 = smov 128   ;;  %s1499_s11 = smov 8  }
 0x112   : > { %1225 = dma.vmem_to_hbm [thread:$0]  (%p2368_p7), %s2288_s7, 768, %s2286_s8, %s908_s18, %s1498_s29, %s1498_s29, %s1499_s11  }
 0x113 PF: > { %s938_s24 = sand.u32 1, %s1469_s15   ;;  %p2369_p13 = scmp.ne.s32.totalorder %s2357_s28, 0 }
 0x114   : > { %p2370_p4 = scmp.ge.s32.totalorder %s1489_s20, 2  ;;  %s939_s23 = scalar_lea.sflag [#allocation4], %s938_s24 }
 0x116   : > { %p1242_p10 = pnand %p2370_p4, %p2369_p13 }
 0x118   : > { %1464 = dma.done.wait (!%p1242_p10), %s939_s23, 768  }
 0x119   : > { %1466 = vsyncadd (!%p1242_p10), %s939_s23, 4294966528  ;;  %s25_s20 = sadd.s32 1, %s1489_s20   ;;  %s2371_s15 = smov %s1473_s16 }
 0x11a   : > { %p22_p2 = scmp.ge.s32.totalorder %s25_s20, 4   ;;  %s2372_s16 = smov %s1477_s17 }
 0x11b   : > { %s2373_s17 = smov %s1639_s13  ;;  %s2374_s18 = smov %s1485_s19 }
 0x11c   : > { %s2375_s19 = smov %s2377_s22  ;;  %24 = sbr.rel (!%p22_p2) target bundleno = 14 (0xe), region = 118 }
 0x123   :  { %944 = vsyncpa [#allocation3], 1 }
 0x124   :  { %946 = vsyncpa [#allocation3 + $0x1], 1 }
 0x125   :  { %947 = vsyncpa [#allocation7], 1 }
 0x126   :  { %949 = vsyncpa [#allocation7 + $0x1], 1 }
 0x127   :  { %950 = vsyncpa [#allocation4], 1 }
 0x128   :  { %952 = vsyncpa [#allocation4 + $0x1], 1 }
 0x129   :  { %953 = vsyncpa [#allocation5], 1 }
 0x12a   :  { %955 = vsyncpa [#allocation5 + $0x1], 1 }
 0x12b   :  { %956 = vsyncpa [#allocation10], 1 }

</bundles_post_ra>
